<compile_context>
chip_gen: v6e
topology: v6e:2x2x1
jax: 0.10.0
libtpu: 0.0.40
codegen_flags: <defaults>
</compile_context>

<pallas_src>
import functools

import jax
import jax.numpy as jnp
from jax.experimental import pallas as pl
from jax.experimental.pallas import tpu as pltpu


def _round_up(x, m):
    return ((x + m - 1) // m) * m


# --------------------------------------------------------------------------
# Pass 1: tiled conv matmul + per-tile partial batch statistics.
# --------------------------------------------------------------------------
def _conv_stats_kernel(p_ref, w_ref, conv_ref, sum_ref, sq_ref):
    """p_ref: (tm, Kp) bf16 patches, w_ref: (Kp, Cp) bf16 weights.

    conv_ref: (tm, Cp) bf16 conv tile (f32 accumulation on the MXU).
    sum_ref / sq_ref: (8, Cp) f32 partial channel sum / sumsq (row 0 carries
    the value, rows 1..7 are zero so a plain sum over rows finalizes them).
    """
    conv = jnp.dot(p_ref[...], w_ref[...], preferred_element_type=jnp.float32)
    conv_ref[...] = conv.astype(conv_ref.dtype)

    s = jnp.sum(conv, axis=0, keepdims=True)
    sq = jnp.sum(conv * conv, axis=0, keepdims=True)
    row = jax.lax.broadcasted_iota(jnp.int32, sum_ref.shape, 0)
    sum_ref[...] = jnp.where(row == 0, s, 0.0)
    sq_ref[...] = jnp.where(row == 0, sq, 0.0)


# --------------------------------------------------------------------------
# Finalize: reduce partial stats -> per-channel BN scale / shift.
# --------------------------------------------------------------------------
def _bn_finalize_kernel(sum_ref, sq_ref, g_ref, b_ref, scale_ref, shift_ref,
                        *, m_total, eps):
    inv_m = 1.0 / m_total                        # real row count; padded rows are zero
    mean = jnp.sum(sum_ref[...], axis=0, keepdims=True) * inv_m
    ex2 = jnp.sum(sq_ref[...], axis=0, keepdims=True) * inv_m
    # TODO(synk): single-pass var = E[x^2] - mean^2 (clamped) is less stable
    # than PyTorch's two-pass BN for very large M / activation magnitudes.
    var = jnp.maximum(ex2 - mean * mean, 0.0)
    scale = g_ref[...] * jax.lax.rsqrt(var + eps)
    scale_ref[...] = scale
    shift_ref[...] = b_ref[...] - mean * scale


# --------------------------------------------------------------------------
# Pass 2: tiled normalize (+ residual) (+ ReLU) streaming epilogue.
# --------------------------------------------------------------------------
def _bn_act_kernel(conv_ref, scale_ref, shift_ref, *rest, relu, has_residual):
    if has_residual:
        r_ref, o_ref = rest
    else:
        (o_ref,) = rest

    out = conv_ref[...].astype(jnp.float32) * scale_ref[...] + shift_ref[...]
    if has_residual:
        out = out + r_ref[...].astype(jnp.float32)
    if relu:
        out = jnp.maximum(out, 0.0)
    o_ref[...] = out.astype(o_ref.dtype)


# --------------------------------------------------------------------------
# Wrapper glue: bf16 im2col, channel/row padding, BlockSpecs, pallas_calls.
# --------------------------------------------------------------------------
def _im2col(x_nhwc, KH, KW, stride, pad):
    """Return (M, KH*KW*Cin) patch matrix and (N, Ho, Wo)."""
    N, H, W, Cin = x_nhwc.shape
    Ho = (H + 2 * pad - KH) // stride + 1
    Wo = (W + 2 * pad - KW) // stride + 1
    xp = x_nhwc if pad == 0 else jnp.pad(
        x_nhwc, ((0, 0), (pad, pad), (pad, pad), (0, 0)))
    cols = []
    for kh in range(KH):
        for kw in range(KW):
            patch = xp[:, kh:kh + (Ho - 1) * stride + 1:stride,
                       kw:kw + (Wo - 1) * stride + 1:stride, :]
            cols.append(patch.reshape(N * Ho * Wo, Cin))
    if len(cols) == 1:
        patches = cols[0]
    else:
        patches = jnp.concatenate(cols, axis=1)   # (kh,kw)-major, Cin-minor: matches HWIO flatten
    return patches, (N, Ho, Wo)


def conv_bn(x_nhwc, w_hwio, gamma, beta, *, stride=1, pad=1, relu=False,
            residual=None, eps=1e-5, tm=256, tm2=2048, out_dtype=jnp.float32):
    """Fused conv(3x3/1x1) + BatchNorm(train stats) (+ residual) (+ ReLU)."""
    KH, KW, _, Cout = w_hwio.shape

    # bf16 from the start: the expanded patch matrix is the largest array in
    # the block; building it in bf16 halves its HBM round trip.
    patches, (N, Ho, Wo) = _im2col(x_nhwc.astype(jnp.bfloat16),
                                   KH, KW, stride, pad)
    M, K = patches.shape

    Kp = _round_up(K, 128)                 # lane-dense contraction dim
    Cp = _round_up(Cout, 128)              # lane-dense output channels

    # Pass-1 tile rows (multiple of 16 for bf16 sublane packing; default 256
    # tiles the v6e/v7x 256x256 MXU cleanly). Pass-2 tile rows are decoupled
    # and much larger (pure streaming epilogue), kept a multiple of tm.
    tm = max(16, min(tm, _round_up(M, 16)))
    tm2 = max(tm, (min(tm2, _round_up(M, tm)) // tm) * tm)
    Mp = _round_up(M, tm2)
    n1 = Mp // tm
    n2 = Mp // tm2

    # Zero padding keeps the math exact: padded rows / K columns / channels
    # contribute 0 to the matmul and to sum / sumsq (divisor is the real M).
    if (Mp, Kp) != (M, K):
        patches = jnp.pad(patches, ((0, Mp - M), (0, Kp - K)))
    w2 = jnp.pad(w_hwio.astype(jnp.bfloat16).reshape(K, Cout),
                 ((0, Kp - K), (0, Cp - Cout)))
    g2 = jnp.pad(gamma.astype(jnp.float32).reshape(1, Cout),
                 ((0, 0), (0, Cp - Cout)))
    b2 = jnp.pad(beta.astype(jnp.float32).reshape(1, Cout),
                 ((0, 0), (0, Cp - Cout)))

    # ---- Pass 1: conv + per-tile partial stats (fully parallel M axis) ----
    p1_vmem = (2 * (tm * Kp * 2 + tm * Cp * 2 + 2 * 8 * Cp * 4)
               + 2 * Kp * Cp * 2)
    conv_out, sum_parts, sq_parts = pl.pallas_call(
        _conv_stats_kernel,
        out_shape=(jax.ShapeDtypeStruct((Mp, Cp), jnp.bfloat16),
                   jax.ShapeDtypeStruct((n1 * 8, Cp), jnp.float32),
                   jax.ShapeDtypeStruct((n1 * 8, Cp), jnp.float32)),
        grid=(n1,),
        in_specs=[
            pl.BlockSpec((tm, Kp), lambda i: (i, 0)),
            pl.BlockSpec((Kp, Cp), lambda i: (0, 0)),   # constant block: reused across steps
        ],
        out_specs=(
            pl.BlockSpec((tm, Cp), lambda i: (i, 0)),
            pl.BlockSpec((8, Cp), lambda i: (i, 0)),
            pl.BlockSpec((8, Cp), lambda i: (i, 0)),
        ),
        compiler_params=pltpu.CompilerParams(
            dimension_semantics=("parallel",),
            vmem_limit_bytes=int(min(max(2 * p1_vmem, 32 * 2**20), 64 * 2**20))),
    )(patches, w2)

    # ---- Finalize BN scale / shift (tiny, single invocation) ----
    scale, shift = pl.pallas_call(
        functools.partial(_bn_finalize_kernel, m_total=float(M), eps=eps),
        out_shape=(jax.ShapeDtypeStruct((1, Cp), jnp.float32),
                   jax.ShapeDtypeStruct((1, Cp), jnp.float32)),
    )(sum_parts, sq_parts, g2, b2)

    # ---- Pass 2: normalize + residual + ReLU (big streaming tiles) ----
    inputs = [conv_out, scale, shift]
    in_specs = [
        pl.BlockSpec((tm2, Cp), lambda i: (i, 0)),
        pl.BlockSpec((1, Cp), lambda i: (0, 0)),
        pl.BlockSpec((1, Cp), lambda i: (0, 0)),
    ]
    if residual is not None:
        res = residual.reshape(M, Cout).astype(jnp.bfloat16)
        if (Mp, Cp) != (M, Cout):
            res = jnp.pad(res, ((0, Mp - M), (0, Cp - Cout)))
        inputs.append(res)
        in_specs.append(pl.BlockSpec((tm2, Cp), lambda i: (i, 0)))

    p2_vmem = 2 * (tm2 * Cp * 2 * (2 if residual is not None else 1)
                   + tm2 * Cp * jnp.dtype(out_dtype).itemsize
                   + 2 * Cp * 4)
    out_flat = pl.pallas_call(
        functools.partial(_bn_act_kernel, relu=relu,
                          has_residual=residual is not None),
        out_shape=jax.ShapeDtypeStruct((Mp, Cp), out_dtype),
        grid=(n2,),
        in_specs=in_specs,
        out_specs=pl.BlockSpec((tm2, Cp), lambda i: (i, 0)),
        compiler_params=pltpu.CompilerParams(
            dimension_semantics=("parallel",),
            vmem_limit_bytes=int(min(max(2 * p2_vmem, 32 * 2**20), 64 * 2**20))),
    )(*inputs)

    return out_flat[:M, :Cout].reshape(N, Ho, Wo, Cout)


# --------------------------------------------------------------------------
# BasicBlock forward.
# --------------------------------------------------------------------------
def init_basic_block_params(key, in_planes, planes, stride=1):
    """Deterministic synthetic parameters matching BasicBlock.__init__ shapes."""
    expansion = 1
    keys = jax.random.split(key, 9)
    params = {
        "w1": 0.1 * jax.random.normal(keys[0], (3, 3, in_planes, planes), jnp.float32),
        "g1": 1.0 + 0.1 * jax.random.normal(keys[1], (planes,), jnp.float32),
        "b1": 0.1 * jax.random.normal(keys[2], (planes,), jnp.float32),
        "w2": 0.1 * jax.random.normal(keys[3], (3, 3, planes, planes), jnp.float32),
        "g2": 1.0 + 0.1 * jax.random.normal(keys[4], (planes,), jnp.float32),
        "b2": 0.1 * jax.random.normal(keys[5], (planes,), jnp.float32),
    }
    if stride != 1 or in_planes != expansion * planes:
        params["ws"] = 0.1 * jax.random.normal(
            keys[6], (1, 1, in_planes, expansion * planes), jnp.float32)
        params["gs"] = 1.0 + 0.1 * jax.random.normal(
            keys[7], (expansion * planes,), jnp.float32)
        params["bs"] = 0.1 * jax.random.normal(
            keys[8], (expansion * planes,), jnp.float32)
    return params


def basic_block_forward(x_nchw, params, *, stride=1):
    """out = relu(bn2(conv2(relu(bn1(conv1(x))))) + shortcut(x)), NCHW in/out."""
    x = jnp.transpose(x_nchw, (0, 2, 3, 1))          # NCHW -> NHWC

    # conv1 + bn1 + relu (inter-layer intermediate kept in bf16)
    out1 = conv_bn(x, params["w1"], params["g1"], params["b1"],
                   stride=stride, pad=1, relu=True, out_dtype=jnp.bfloat16)

    if "ws" in params:                                # 1x1 conv + bn shortcut (bf16 residual)
        sc = conv_bn(x, params["ws"], params["gs"], params["bs"],
                     stride=stride, pad=0, relu=False, out_dtype=jnp.bfloat16)
    else:                                             # identity shortcut
        sc = x

    # conv2 + bn2 + residual add + relu
    out = conv_bn(out1, params["w2"], params["g2"], params["b2"],
                  stride=1, pad=1, relu=True, residual=sc)

    return jnp.transpose(out, (0, 3, 1, 2))           # NHWC -> NCHW


if __name__ == "__main__":
    key = jax.random.PRNGKey(0)
    kx, kp = jax.random.split(key)

    N, in_planes, planes, H, W = 2, 4, 8, 16, 16
    stride = 1  # in_planes != planes exercises the 1x1 shortcut branch

    x = jax.random.normal(kx, (N, in_planes, H, W), jnp.float32)   # NCHW like PyTorch
    params = init_basic_block_params(kp, in_planes, planes, stride)

    fwd = jax.jit(functools.partial(basic_block_forward, stride=stride))
    y = fwd(x, params)
    jax.block_until_ready(y)

    assert y.shape == (N, planes, H // stride, W // stride)
    assert bool(jnp.all(y >= 0.0))  # final ReLU
    print("KERNEL_OK")
</pallas_src>

<mosaic_0001>
module attributes {stable_mosaic.version = 11 : i64} {
  func.func @_conv_stats_kernel(%arg0: i32, %arg1: memref<256x128xbf16, #tpu.memory_space<vmem>>, %arg2: memref<128x128xbf16, #tpu.memory_space<vmem>>, %arg3: memref<256x128xbf16, #tpu.memory_space<vmem>>, %arg4: memref<8x128xf32, #tpu.memory_space<vmem>>, %arg5: memref<8x128xf32, #tpu.memory_space<vmem>>) attributes {dimension_semantics = [#tpu.dimension_semantics<parallel>], iteration_bounds = array<i64: 2>, scalar_prefetch = 0 : i64, scratch_operands = 0 : i64, tpu.core_type = #tpu.core_type<tc>, window_params = [{transform_indices = @transform_0, window_bounds = array<i64: 256, 128>}, {pipeline_mode = #tpu.pipeline_mode<synchronous>, transform_indices = @transform_1, window_bounds = array<i64: 128, 128>}, {transform_indices = @transform_2, window_bounds = array<i64: 256, 128>}, {transform_indices = @transform_3, window_bounds = array<i64: 8, 128>}, {transform_indices = @transform_4, window_bounds = array<i64: 8, 128>}]} {
    %c0 = arith.constant 0 : index
    %c0_0 = arith.constant 0 : index
    %0 = vector.load %arg1[%c0, %c0_0] : memref<256x128xbf16, #tpu.memory_space<vmem>>, vector<256x128xbf16>
    %c0_1 = arith.constant 0 : index
    %c0_2 = arith.constant 0 : index
    %1 = vector.load %arg2[%c0_1, %c0_2] : memref<128x128xbf16, #tpu.memory_space<vmem>>, vector<128x128xbf16>
    %cst = arith.constant dense<0.000000e+00> : vector<256x128xf32>
    %2 = tpu.matmul %0, %1, %cst {dimension_numbers = #tpu.dot_dimension_numbers<[1], [0], [0], [1], [0, 0, 1, 1], [], []>} : vector<256x128xbf16>, vector<128x128xbf16>, vector<256x128xf32> -> vector<256x128xf32>
    %3 = arith.truncf %2 : vector<256x128xf32> to vector<256x128xbf16>
    %c0_3 = arith.constant 0 : index
    %c0_4 = arith.constant 0 : index
    %4 = vector.load %arg3[%c0_3, %c0_4] : memref<256x128xbf16, #tpu.memory_space<vmem>>, vector<256x128xbf16>
    tpu.vector_store %arg3[%c0_3, %c0_4], %3 {strides = array<i32>} : memref<256x128xbf16, #tpu.memory_space<vmem>>, vector<256x128xbf16>,
    %cst_5 = arith.constant dense<0.000000e+00> : vector<128xf32>
    %5 = vector.multi_reduction <add>, %2, %cst_5 [0] : vector<256x128xf32> to vector<128xf32>
    %6 = vector.shape_cast %5 : vector<128xf32> to vector<1x128xf32>
    %7 = arith.mulf %2, %2 : vector<256x128xf32>
    %cst_6 = arith.constant dense<0.000000e+00> : vector<128xf32>
    %8 = vector.multi_reduction <add>, %7, %cst_6 [0] : vector<256x128xf32> to vector<128xf32>
    %9 = vector.shape_cast %8 : vector<128xf32> to vector<1x128xf32>
    %10 = tpu.iota {dimensions = array<i32: 0>} : vector<8x128xi32>
    %c0_i32 = arith.constant 0 : i32
    %11 = vector.broadcast %c0_i32 : i32 to vector<8x128xi32>
    %12 = arith.cmpi eq, %10, %11 : vector<8x128xi32>
    %cst_7 = arith.constant 0.000000e+00 : f32
    %13 = vector.shape_cast %6 : vector<1x128xf32> to vector<1x128xf32>
    %14 = vector.broadcast %13 : vector<1x128xf32> to vector<8x128xf32>
    %15 = vector.broadcast %cst_7 : f32 to vector<8x128xf32>
    %16 = arith.select %12, %14, %15 : vector<8x128xi1>, vector<8x128xf32>
    %c0_8 = arith.constant 0 : index
    %c0_9 = arith.constant 0 : index
    %17 = vector.load %arg4[%c0_8, %c0_9] : memref<8x128xf32, #tpu.memory_space<vmem>>, vector<8x128xf32>
    tpu.vector_store %arg4[%c0_8, %c0_9], %16 {strides = array<i32>} : memref<8x128xf32, #tpu.memory_space<vmem>>, vector<8x128xf32>,
    %c0_i32_10 = arith.constant 0 : i32
    %18 = vector.broadcast %c0_i32_10 : i32 to vector<8x128xi32>
    %19 = arith.cmpi eq, %10, %18 : vector<8x128xi32>
    %cst_11 = arith.constant 0.000000e+00 : f32
    %20 = vector.shape_cast %9 : vector<1x128xf32> to vector<1x128xf32>
    %21 = vector.broadcast %20 : vector<1x128xf32> to vector<8x128xf32>
    %22 = vector.broadcast %cst_11 : f32 to vector<8x128xf32>
    %23 = arith.select %19, %21, %22 : vector<8x128xi1>, vector<8x128xf32>
    %c0_12 = arith.constant 0 : index
    %c0_13 = arith.constant 0 : index
    %24 = vector.load %arg5[%c0_12, %c0_13] : memref<8x128xf32, #tpu.memory_space<vmem>>, vector<8x128xf32>
    tpu.vector_store %arg5[%c0_12, %c0_13], %23 {strides = array<i32>} : memref<8x128xf32, #tpu.memory_space<vmem>>, vector<8x128xf32>,
    return
  }
  func.func @transform_0(%arg0: i32) -> (i32, i32) {
    %c0_i32 = arith.constant 0 : i32
    %c0_i32_0 = arith.constant 0 : i32
    return %arg0, %c0_i32 : i32, i32
  }
  func.func @transform_1(%arg0: i32) -> (i32, i32) {
    %c0_i32 = arith.constant 0 : i32
    %c0_i32_0 = arith.constant 0 : i32
    %c0_i32_1 = arith.constant 0 : i32
    return %c0_i32, %c0_i32_0 : i32, i32
  }
  func.func @transform_2(%arg0: i32) -> (i32, i32) {
    %c0_i32 = arith.constant 0 : i32
    %c0_i32_0 = arith.constant 0 : i32
    return %arg0, %c0_i32 : i32, i32
  }
  func.func @transform_3(%arg0: i32) -> (i32, i32) {
    %c0_i32 = arith.constant 0 : i32
    %c0_i32_0 = arith.constant 0 : i32
    return %arg0, %c0_i32 : i32, i32
  }
  func.func @transform_4(%arg0: i32) -> (i32, i32) {
    %c0_i32 = arith.constant 0 : i32
    %c0_i32_0 = arith.constant 0 : i32
    return %arg0, %c0_i32 : i32, i32
  }
}

module attributes {stable_mosaic.version = 11 : i64} {
  func.func @_bn_act_kernel(%arg0: i32, %arg1: memref<512x128xbf16, #tpu.memory_space<vmem>>, %arg2: memref<1x128xf32, #tpu.memory_space<vmem>>, %arg3: memref<1x128xf32, #tpu.memory_space<vmem>>, %arg4: memref<512x128xbf16, #tpu.memory_space<vmem>>) attributes {dimension_semantics = [#tpu.dimension_semantics<parallel>], iteration_bounds = array<i64: 1>, scalar_prefetch = 0 : i64, scratch_operands = 0 : i64, tpu.core_type = #tpu.core_type<tc>, window_params = [{transform_indices = @transform_0, window_bounds = array<i64: 512, 128>}, {pipeline_mode = #tpu.pipeline_mode<synchronous>, transform_indices = @transform_1, window_bounds = array<i64: 1, 128>}, {pipeline_mode = #tpu.pipeline_mode<synchronous>, transform_indices = @transform_2, window_bounds = array<i64: 1, 128>}, {transform_indices = @transform_3, window_bounds = array<i64: 512, 128>}]} {
    %c0 = arith.constant 0 : index
    %c0_0 = arith.constant 0 : index
    %0 = vector.load %arg1[%c0, %c0_0] : memref<512x128xbf16, #tpu.memory_space<vmem>>, vector<512x128xbf16>
    %1 = arith.extf %0 : vector<512x128xbf16> to vector<512x128xf32>
    %c0_1 = arith.constant 0 : index
    %c0_2 = arith.constant 0 : index
    %2 = vector.load %arg2[%c0_1, %c0_2] : memref<1x128xf32, #tpu.memory_space<vmem>>, vector<1x128xf32>
    %3 = vector.broadcast %2 : vector<1x128xf32> to vector<512x128xf32>
    %4 = arith.mulf %1, %3 : vector<512x128xf32>
    %c0_3 = arith.constant 0 : index
    %c0_4 = arith.constant 0 : index
    %5 = vector.load %arg3[%c0_3, %c0_4] : memref<1x128xf32, #tpu.memory_space<vmem>>, vector<1x128xf32>
    %6 = vector.broadcast %5 : vector<1x128xf32> to vector<512x128xf32>
    %7 = arith.addf %4, %6 : vector<512x128xf32>
    %cst = arith.constant 0.000000e+00 : f32
    %8 = vector.broadcast %cst : f32 to vector<512x128xf32>
    %9 = arith.maximumf %7, %8 : vector<512x128xf32>
    %10 = arith.truncf %9 : vector<512x128xf32> to vector<512x128xbf16>
    %c0_5 = arith.constant 0 : index
    %c0_6 = arith.constant 0 : index
    %11 = vector.load %arg4[%c0_5, %c0_6] : memref<512x128xbf16, #tpu.memory_space<vmem>>, vector<512x128xbf16>
    tpu.vector_store %arg4[%c0_5, %c0_6], %10 {strides = array<i32>} : memref<512x128xbf16, #tpu.memory_space<vmem>>, vector<512x128xbf16>,
    return
  }
  func.func @transform_0(%arg0: i32) -> (i32, i32) {
    %c0_i32 = arith.constant 0 : i32
    %c0_i32_0 = arith.constant 0 : i32
    return %arg0, %c0_i32 : i32, i32
  }
  func.func @transform_1(%arg0: i32) -> (i32, i32) {
    %c0_i32 = arith.constant 0 : i32
    %c0_i32_0 = arith.constant 0 : i32
    %c0_i32_1 = arith.constant 0 : i32
    return %c0_i32, %c0_i32_0 : i32, i32
  }
  func.func @transform_2(%arg0: i32) -> (i32, i32) {
    %c0_i32 = arith.constant 0 : i32
    %c0_i32_0 = arith.constant 0 : i32
    %c0_i32_1 = arith.constant 0 : i32
    return %c0_i32, %c0_i32_0 : i32, i32
  }
  func.func @transform_3(%arg0: i32) -> (i32, i32) {
    %c0_i32 = arith.constant 0 : i32
    %c0_i32_0 = arith.constant 0 : i32
    return %arg0, %c0_i32 : i32, i32
  }
}

module attributes {stable_mosaic.version = 11 : i64} {
  func.func @_bn_finalize_kernel(%arg0: memref<16x128xf32, #tpu.memory_space<vmem>>, %arg1: memref<16x128xf32, #tpu.memory_space<vmem>>, %arg2: memref<1x128xf32, #tpu.memory_space<vmem>>, %arg3: memref<1x128xf32, #tpu.memory_space<vmem>>, %arg4: memref<1x128xf32, #tpu.memory_space<vmem>>, %arg5: memref<1x128xf32, #tpu.memory_space<vmem>>) attributes {dimension_semantics = [], scalar_prefetch = 0 : i64, scratch_operands = 0 : i64, tpu.core_type = #tpu.core_type<tc>} {
    %c0 = arith.constant 0 : index
    %c0_0 = arith.constant 0 : index
    %0 = vector.load %arg0[%c0, %c0_0] : memref<16x128xf32, #tpu.memory_space<vmem>>, vector<16x128xf32>
    %cst = arith.constant dense<0.000000e+00> : vector<128xf32>
    %1 = vector.multi_reduction <add>, %0, %cst [0] : vector<16x128xf32> to vector<128xf32>
    %2 = vector.shape_cast %1 : vector<128xf32> to vector<1x128xf32>
    %cst_1 = arith.constant 0.001953125 : f32
    %3 = vector.broadcast %cst_1 : f32 to vector<1x128xf32>
    %4 = arith.mulf %2, %3 : vector<1x128xf32>
    %c0_2 = arith.constant 0 : index
    %c0_3 = arith.constant 0 : index
    %5 = vector.load %arg1[%c0_2, %c0_3] : memref<16x128xf32, #tpu.memory_space<vmem>>, vector<16x128xf32>
    %cst_4 = arith.constant dense<0.000000e+00> : vector<128xf32>
    %6 = vector.multi_reduction <add>, %5, %cst_4 [0] : vector<16x128xf32> to vector<128xf32>
    %7 = vector.shape_cast %6 : vector<128xf32> to vector<1x128xf32>
    %cst_5 = arith.constant 0.001953125 : f32
    %8 = vector.broadcast %cst_5 : f32 to vector<1x128xf32>
    %9 = arith.mulf %7, %8 : vector<1x128xf32>
    %10 = arith.mulf %4, %4 : vector<1x128xf32>
    %11 = arith.subf %9, %10 : vector<1x128xf32>
    %cst_6 = arith.constant 0.000000e+00 : f32
    %12 = vector.broadcast %cst_6 : f32 to vector<1x128xf32>
    %13 = arith.maximumf %11, %12 : vector<1x128xf32>
    %c0_7 = arith.constant 0 : index
    %c0_8 = arith.constant 0 : index
    %14 = vector.load %arg2[%c0_7, %c0_8] : memref<1x128xf32, #tpu.memory_space<vmem>>, vector<1x128xf32>
    %cst_9 = arith.constant 9.99999974E-6 : f32
    %15 = vector.broadcast %cst_9 : f32 to vector<1x128xf32>
    %16 = arith.addf %13, %15 : vector<1x128xf32>
    %17 = math.rsqrt %16 : vector<1x128xf32>
    %18 = arith.mulf %14, %17 : vector<1x128xf32>
    %c0_10 = arith.constant 0 : index
    %c0_11 = arith.constant 0 : index
    %19 = vector.load %arg4[%c0_10, %c0_11] : memref<1x128xf32, #tpu.memory_space<vmem>>, vector<1x128xf32>
    tpu.vector_store %arg4[%c0_10, %c0_11], %18 {strides = array<i32>} : memref<1x128xf32, #tpu.memory_space<vmem>>, vector<1x128xf32>,
    %c0_12 = arith.constant 0 : index
    %c0_13 = arith.constant 0 : index
    %20 = vector.load %arg3[%c0_12, %c0_13] : memref<1x128xf32, #tpu.memory_space<vmem>>, vector<1x128xf32>
    %21 = arith.mulf %4, %18 : vector<1x128xf32>
    %22 = arith.subf %20, %21 : vector<1x128xf32>
    %c0_14 = arith.constant 0 : index
    %c0_15 = arith.constant 0 : index
    %23 = vector.load %arg5[%c0_14, %c0_15] : memref<1x128xf32, #tpu.memory_space<vmem>>, vector<1x128xf32>
    tpu.vector_store %arg5[%c0_14, %c0_15], %22 {strides = array<i32>} : memref<1x128xf32, #tpu.memory_space<vmem>>, vector<1x128xf32>,
    return
  }
}

module attributes {stable_mosaic.version = 11 : i64} {
  func.func @_bn_act_kernel(%arg0: i32, %arg1: memref<512x128xbf16, #tpu.memory_space<vmem>>, %arg2: memref<1x128xf32, #tpu.memory_space<vmem>>, %arg3: memref<1x128xf32, #tpu.memory_space<vmem>>, %arg4: memref<512x128xbf16, #tpu.memory_space<vmem>>) attributes {dimension_semantics = [#tpu.dimension_semantics<parallel>], iteration_bounds = array<i64: 1>, scalar_prefetch = 0 : i64, scratch_operands = 0 : i64, tpu.core_type = #tpu.core_type<tc>, window_params = [{transform_indices = @transform_0, window_bounds = array<i64: 512, 128>}, {pipeline_mode = #tpu.pipeline_mode<synchronous>, transform_indices = @transform_1, window_bounds = array<i64: 1, 128>}, {pipeline_mode = #tpu.pipeline_mode<synchronous>, transform_indices = @transform_2, window_bounds = array<i64: 1, 128>}, {transform_indices = @transform_3, window_bounds = array<i64: 512, 128>}]} {
    %c0 = arith.constant 0 : index
    %c0_0 = arith.constant 0 : index
    %0 = vector.load %arg1[%c0, %c0_0] : memref<512x128xbf16, #tpu.memory_space<vmem>>, vector<512x128xbf16>
    %1 = arith.extf %0 : vector<512x128xbf16> to vector<512x128xf32>
    %c0_1 = arith.constant 0 : index
    %c0_2 = arith.constant 0 : index
    %2 = vector.load %arg2[%c0_1, %c0_2] : memref<1x128xf32, #tpu.memory_space<vmem>>, vector<1x128xf32>
    %3 = vector.broadcast %2 : vector<1x128xf32> to vector<512x128xf32>
    %4 = arith.mulf %1, %3 : vector<512x128xf32>
    %c0_3 = arith.constant 0 : index
    %c0_4 = arith.constant 0 : index
    %5 = vector.load %arg3[%c0_3, %c0_4] : memref<1x128xf32, #tpu.memory_space<vmem>>, vector<1x128xf32>
    %6 = vector.broadcast %5 : vector<1x128xf32> to vector<512x128xf32>
    %7 = arith.addf %4, %6 : vector<512x128xf32>
    %8 = arith.truncf %7 : vector<512x128xf32> to vector<512x128xbf16>
    %c0_5 = arith.constant 0 : index
    %c0_6 = arith.constant 0 : index
    %9 = vector.load %arg4[%c0_5, %c0_6] : memref<512x128xbf16, #tpu.memory_space<vmem>>, vector<512x128xbf16>
    tpu.vector_store %arg4[%c0_5, %c0_6], %8 {strides = array<i32>} : memref<512x128xbf16, #tpu.memory_space<vmem>>, vector<512x128xbf16>,
    return
  }
  func.func @transform_0(%arg0: i32) -> (i32, i32) {
    %c0_i32 = arith.constant 0 : i32
    %c0_i32_0 = arith.constant 0 : i32
    return %arg0, %c0_i32 : i32, i32
  }
  func.func @transform_1(%arg0: i32) -> (i32, i32) {
    %c0_i32 = arith.constant 0 : i32
    %c0_i32_0 = arith.constant 0 : i32
    %c0_i32_1 = arith.constant 0 : i32
    return %c0_i32, %c0_i32_0 : i32, i32
  }
  func.func @transform_2(%arg0: i32) -> (i32, i32) {
    %c0_i32 = arith.constant 0 : i32
    %c0_i32_0 = arith.constant 0 : i32
    %c0_i32_1 = arith.constant 0 : i32
    return %c0_i32, %c0_i32_0 : i32, i32
  }
  func.func @transform_3(%arg0: i32) -> (i32, i32) {
    %c0_i32 = arith.constant 0 : i32
    %c0_i32_0 = arith.constant 0 : i32
    return %arg0, %c0_i32 : i32, i32
  }
}

module attributes {stable_mosaic.version = 11 : i64} {
  func.func @_bn_act_kernel(%arg0: i32, %arg1: memref<512x128xbf16, #tpu.memory_space<vmem>>, %arg2: memref<1x128xf32, #tpu.memory_space<vmem>>, %arg3: memref<1x128xf32, #tpu.memory_space<vmem>>, %arg4: memref<512x128xbf16, #tpu.memory_space<vmem>>, %arg5: memref<512x128xf32, #tpu.memory_space<vmem>>) attributes {dimension_semantics = [#tpu.dimension_semantics<parallel>], iteration_bounds = array<i64: 1>, scalar_prefetch = 0 : i64, scratch_operands = 0 : i64, tpu.core_type = #tpu.core_type<tc>, window_params = [{transform_indices = @transform_0, window_bounds = array<i64: 512, 128>}, {pipeline_mode = #tpu.pipeline_mode<synchronous>, transform_indices = @transform_1, window_bounds = array<i64: 1, 128>}, {pipeline_mode = #tpu.pipeline_mode<synchronous>, transform_indices = @transform_2, window_bounds = array<i64: 1, 128>}, {transform_indices = @transform_3, window_bounds = array<i64: 512, 128>}, {transform_indices = @transform_4, window_bounds = array<i64: 512, 128>}]} {
    %c0 = arith.constant 0 : index
    %c0_0 = arith.constant 0 : index
    %0 = vector.load %arg1[%c0, %c0_0] : memref<512x128xbf16, #tpu.memory_space<vmem>>, vector<512x128xbf16>
    %1 = arith.extf %0 : vector<512x128xbf16> to vector<512x128xf32>
    %c0_1 = arith.constant 0 : index
    %c0_2 = arith.constant 0 : index
    %2 = vector.load %arg2[%c0_1, %c0_2] : memref<1x128xf32, #tpu.memory_space<vmem>>, vector<1x128xf32>
    %3 = vector.broadcast %2 : vector<1x128xf32> to vector<512x128xf32>
    %4 = arith.mulf %1, %3 : vector<512x128xf32>
    %c0_3 = arith.constant 0 : index
    %c0_4 = arith.constant 0 : index
    %5 = vector.load %arg3[%c0_3, %c0_4] : memref<1x128xf32, #tpu.memory_space<vmem>>, vector<1x128xf32>
    %6 = vector.broadcast %5 : vector<1x128xf32> to vector<512x128xf32>
    %7 = arith.addf %4, %6 : vector<512x128xf32>
    %c0_5 = arith.constant 0 : index
    %c0_6 = arith.constant 0 : index
    %8 = vector.load %arg4[%c0_5, %c0_6] : memref<512x128xbf16, #tpu.memory_space<vmem>>, vector<512x128xbf16>
    %9 = arith.extf %8 : vector<512x128xbf16> to vector<512x128xf32>
    %10 = arith.addf %7, %9 : vector<512x128xf32>
    %cst = arith.constant 0.000000e+00 : f32
    %11 = vector.broadcast %cst : f32 to vector<512x128xf32>
    %12 = arith.maximumf %10, %11 : vector<512x128xf32>
    %c0_7 = arith.constant 0 : index
    %c0_8 = arith.constant 0 : index
    %13 = vector.load %arg5[%c0_7, %c0_8] : memref<512x128xf32, #tpu.memory_space<vmem>>, vector<512x128xf32>
    tpu.vector_store %arg5[%c0_7, %c0_8], %12 {strides = array<i32>} : memref<512x128xf32, #tpu.memory_space<vmem>>, vector<512x128xf32>,
    return
  }
  func.func @transform_0(%arg0: i32) -> (i32, i32) {
    %c0_i32 = arith.constant 0 : i32
    %c0_i32_0 = arith.constant 0 : i32
    return %arg0, %c0_i32 : i32, i32
  }
  func.func @transform_1(%arg0: i32) -> (i32, i32) {
    %c0_i32 = arith.constant 0 : i32
    %c0_i32_0 = arith.constant 0 : i32
    %c0_i32_1 = arith.constant 0 : i32
    return %c0_i32, %c0_i32_0 : i32, i32
  }
  func.func @transform_2(%arg0: i32) -> (i32, i32) {
    %c0_i32 = arith.constant 0 : i32
    %c0_i32_0 = arith.constant 0 : i32
    %c0_i32_1 = arith.constant 0 : i32
    return %c0_i32, %c0_i32_0 : i32, i32
  }
  func.func @transform_3(%arg0: i32) -> (i32, i32) {
    %c0_i32 = arith.constant 0 : i32
    %c0_i32_0 = arith.constant 0 : i32
    return %arg0, %c0_i32 : i32, i32
  }
  func.func @transform_4(%arg0: i32) -> (i32, i32) {
    %c0_i32 = arith.constant 0 : i32
    %c0_i32_0 = arith.constant 0 : i32
    return %arg0, %c0_i32 : i32, i32
  }
}

</mosaic_0001>

<bundles_post_ra>
// kernel: basic_block_forward.10
= control target key start
LH: loop header
LB: loop body
LE: loop exit
PB: predicated region body
PF: predicated region fallthrough
CT: control target
= control target key end

     0   :  { %s115_s0 = inlined_call_operand.vmem [shape: f32[16,128], index: 0, kind: input, shape index: {}]   ;;  %s116_s1 = inlined_call_operand.vmem [shape: f32[16,128], index: 1, kind: input, shape index: {}]   ;;  %s117_s2 = inlined_call_operand.vmem [shape: f32[1,128], index: 2, kind: input, shape index: {}]   ;;  %s118_s3 = inlined_call_operand.vmem [shape: f32[1,128], index: 3, kind: input, shape index: {}]   ;;  %s119_s4 = inlined_call_operand.vmem [shape: f32[1,128], index: 4, kind: output, shape index: {0}]   ;;  %s120_s5 = inlined_call_operand.vmem [shape: f32[1,128], index: 5, kind: output, shape index: {1}]  }
   0x1   :  { %v19_v0 = vld [vmem:[%s115_s0] sm:$0xff]  ;;  %v20_v1 = vld [vmem:[%s115_s0 + $0x8] sm:$0xff] }
   0x2   :  { %v29_v2 = vld [vmem:[%s116_s1] sm:$0xff]  ;;  %v21_v3 = vadd.f32 %v20_v1, %v19_v0  ;;  %v30_v4 = vld [vmem:[%s116_s1 + $0x8] sm:$0xff] }
   0x3   :  { %v31_v5 = vadd.f32 %v30_v4, %v29_v2  ;;  %v42_v24 = vld [vmem:[%s117_s2] sm:$0x1] }
   0x4   :  { %v22_v6 = vrot.slane %v21_v3, 4  ;;  %v47_v27 = vld [vmem:[%s118_s3] sm:$0x1] }
   0x5   :  { %v32_v7 = vrot.slane %v31_v5, 4 }
   0x6   :  { %v23_v8 = vadd.f32 %v22_v6, %v21_v3 }
   0x7   :  { %v33_v9 = vadd.f32 %v32_v7, %v31_v5 }
   0x8   :  { %v24_v10 = vrot.slane %v23_v8, 2 }
   0x9   :  { %v34_v11 = vrot.slane %v33_v9, 2 }
   0xa   :  { %v25_v12 = vadd.f32 %v24_v10, %v23_v8 }
   0xb   :  { %v35_v13 = vadd.f32 %v34_v11, %v33_v9 }
   0xc   :  { %v26_v14 = vrot.slane %v25_v12, 1 }
   0xd   :  { %v36_v15 = vrot.slane %v35_v13, 1 }
   0xe   :  { %v27_v16 = vadd.f32 %v26_v14, %v25_v12 }
   0xf   :  { %v37_v17 = vadd.f32 %v36_v15, %v35_v13 }
  0x10   :  { %v28_v18 = vmul.f32 0.001953125, %v27_v16 }
  0x11   :  { %v38_v19 = vmul.f32 0.001953125, %v37_v17 }
  0x12   :  { %v39_v20 = vmul.f32 %v28_v18, %v28_v18 }
  0x14   :  { %v40_v21 = vsub.f32 %v38_v19, %v39_v20 }
  0x16   :  { %v41_v22 = vmax.f32 %v40_v21, 0.0 }
  0x18   :  { %v43_v23 = vadd.f32 1e-05, %v41_v22 }
  0x1a   :  { %59 = vrsqrt.f32 %v43_v23 }
  0x27   :  { %v60_v25 = vpop.eup %59 }
  0x28   :  { %v45_v26 = vmul.f32 %v60_v25, %v42_v24 }
  0x2a   :  { %46 = vst [vmem:[%s119_s4] sm:$0x1] %v45_v26  ;;  %v48_v28 = vmul.f32 %v45_v26, %v28_v18 }
  0x2c   :  { %v49_v29 = vsub.f32 %v47_v27, %v48_v28 }
  0x2e   :  { %50 = vst [vmem:[%s120_s5] sm:$0x1] %v49_v29 }

// kernel: basic_block_forward.9
= control target key start
LH: loop header
LB: loop body
LE: loop exit
PB: predicated region body
PF: predicated region fallthrough
CT: control target
= control target key end

     0   :  { %s1316_s15 = smov 0   ;;  %s1501_s0 = inlined_call_operand.vmem [shape: bf16[512,128], index: 0, kind: input, shape index: {}]   ;;  %s1502_s1 = inlined_call_operand.vmem [shape: bf16[128,128], index: 1, kind: input, shape index: {}]   ;;  %s1503_s2 = inlined_call_operand.vmem [shape: bf16[512,128], index: 2, kind: output, shape index: {0}]   ;;  %s1504_s3 = inlined_call_operand.vmem [shape: f32[16,128], index: 3, kind: output, shape index: {1}]   ;;  %s1505_s4 = inlined_call_operand.vmem [shape: f32[16,128], index: 4, kind: output, shape index: {2}]  }
   0x1 LB: > { %s1322_s16 = sadd.s32 4294967295, %s1289_s15   ;;  %p971_p0 = scmp.ge.s32.totalorder %s1289_s15, 1  ;;  %s1289_s15 = sphi %s1316_s15, %s15_s15  }
   0x2   : > { %p168_p1 = scmp.lt.s32.totalorder %s1289_s15, 3 }
   0x4   : > { %p169_p2 = pnand %p971_p0, %p168_p1 }
   0x5   : > { %s972_s19 = sshll.u32 (!%p169_p2), %s1322_s16, 5  ;;  %p214_p4 = scmp.lt.s32.totalorder (!%p169_p2), %s1322_s16, 1 }
   0x6   : > { %172 = sbr.rel (%p169_p2) target bundleno = 321 (0x141), region = 28  ;;  %p203_p3 = scmp.lt.s32.totalorder (!%p169_p2), %s972_s19, 63 }
   0xb   : > { %v1259_v0 = vld [vmem:[%s1502_s1 + $0x38] sm:$0xff]   ;;  %v1260_v1 = vld [vmem:[%s1502_s1 + $0x30] sm:$0xff]   ;;  %s1507_s19 = smov (!%p203_p3, %s972_s19), 63  ;;  %v1261_v2 = vld [vmem:[%s1502_s1 + $0x28] sm:$0xff]   ;;  %s1509_s16 = smov (!%p214_p4, %s1322_s16), 1 }
   0xc   : > { %1187 = vmatprep.subr.bf16.mxu0 %v1259_v0  ;;  %1235 = vmatprep.subr.bf16.mxu1 %v1259_v0  ;;  %s973_s24 = sshll.u32 %s1507_s19, 2  ;;  %v1262_v3 = vld [vmem:[%s1502_s1 + $0x20] sm:$0xff]   ;;  %v1263_v5 = vld [vmem:[%s1502_s1 + $0x18] sm:$0xff]   ;;  %v1264_v6 = vld [vmem:[%s1502_s1 + $0x10] sm:$0xff]   ;;  %s976_s17 = sshll.u32 %s1509_s16, 3 }
   0xd   : > { %1188 = vmatpush3.bf16.msra.mxu0 %v1259_v0  ;;  %1243 = vmatpush3.bf16.msra.mxu1 %v1259_v0  ;;  %s1344_s27 = scalar_lea.vmem %s1501_s0, %s973_s24  ;;  %v1265_v8 = vld [vmem:[%s1502_s1 + $0x8] sm:$0xff]   ;;  %v1266_v9 = vld [vmem:[%s1502_s1] sm:$0xff]   ;;  %s1386_s14 = scalar_lea.vmem %s1503_s2, %s973_s24 }
   0xe   : > { %1189 = vmatprep.subr.bf16.mxu0 %v1260_v1  ;;  %1236 = vmatprep.subr.bf16.mxu1 %v1260_v1  ;;  %v1267_v4 = vld [vmem:[%s1344_s27] sm:$0xff]   ;;  %v1268_v10 = vld [vmem:[%s1344_s27 + $0x8] sm:$0xff]   ;;  %v1269_v12 = vld [vmem:[%s1344_s27 + $0x10] sm:$0xff]   ;;  %s217_s20 = scalar_lea.vmem %s1504_s3, %s976_s17  ;;  %s221_s23 = scalar_lea.vmem %s1505_s4, %s976_s17 }
   0xf   : > { %1203 = vmatprep.mubr.bf16.mxu0 %v1267_v4  ;;  %v1275_v7 = vld [vmem:[%s1344_s27 + $0x40] sm:$0xff]   ;;  %v1276_v11 = vld [vmem:[%s1344_s27 + $0x48] sm:$0xff]   ;;  %v1277_v13 = vld [vmem:[%s1344_s27 + $0x50] sm:$0xff]  }
  0x10   : > { %1219 = vmatprep.mubr.bf16.mxu1 %v1275_v7  ;;  %v1270_v14 = vld [vmem:[%s1344_s27 + $0x18] sm:$0xff]   ;;  %v1271_v16 = vld [vmem:[%s1344_s27 + $0x20] sm:$0xff]   ;;  %v1272_v18 = vld [vmem:[%s1344_s27 + $0x28] sm:$0xff]  }
  0x11   : > { %1190 = vmatpush3.bf16.msra.mxu0 %v1260_v1  ;;  %1244 = vmatpush3.bf16.msra.mxu1 %v1260_v1  ;;  %v1278_v15 = vld [vmem:[%s1344_s27 + $0x58] sm:$0xff]   ;;  %v1279_v17 = vld [vmem:[%s1344_s27 + $0x60] sm:$0xff]   ;;  %v1280_v19 = vld [vmem:[%s1344_s27 + $0x68] sm:$0xff]  }
  0x12   : > { %1191 = vmatprep.subr.bf16.mxu0 %v1261_v2  ;;  %1237 = vmatprep.subr.bf16.mxu1 %v1261_v2  ;;  %v1273_v20 = vld [vmem:[%s1344_s27 + $0x30] sm:$0xff]   ;;  %v1274_v22 = vld [vmem:[%s1344_s27 + $0x38] sm:$0xff]  }
  0x13   : > { %v1281_v21 = vld [vmem:[%s1344_s27 + $0x70] sm:$0xff]   ;;  %v1282_v23 = vld [vmem:[%s1344_s27 + $0x78] sm:$0xff]  }
  0x15   : > { %1192 = vmatpush3.bf16.msra.mxu0 %v1261_v2  ;;  %1245 = vmatpush3.bf16.msra.mxu1 %v1261_v2 }
  0x16   : > { %1193 = vmatprep.subr.bf16.mxu0 %v1262_v3  ;;  %1238 = vmatprep.subr.bf16.mxu1 %v1262_v3 }
  0x19   : > { %1194 = vmatpush3.bf16.msra.mxu0 %v1262_v3  ;;  %1246 = vmatpush3.bf16.msra.mxu1 %v1262_v3 }
  0x1a   : > { %1195 = vmatprep.subr.bf16.mxu0 %v1263_v5  ;;  %1239 = vmatprep.subr.bf16.mxu1 %v1263_v5 }
  0x1d   : > { %1196 = vmatpush3.bf16.msra.mxu0 %v1263_v5  ;;  %1247 = vmatpush3.bf16.msra.mxu1 %v1263_v5 }
  0x1e   : > { %1197 = vmatprep.subr.bf16.mxu0 %v1264_v6  ;;  %1240 = vmatprep.subr.bf16.mxu1 %v1264_v6 }
  0x21   : > { %1198 = vmatpush3.bf16.msra.mxu0 %v1264_v6  ;;  %1248 = vmatpush3.bf16.msra.mxu1 %v1264_v6 }
  0x22   : > { %1199 = vmatprep.subr.bf16.mxu0 %v1265_v8  ;;  %1241 = vmatprep.subr.bf16.mxu1 %v1265_v8 }
  0x25   : > { %1200 = vmatpush3.bf16.msra.mxu0 %v1265_v8  ;;  %1249 = vmatpush3.bf16.msra.mxu1 %v1265_v8 }
  0x26   : > { %1201 = vmatprep.subr.bf16.mxu0 %v1266_v9  ;;  %1242 = vmatprep.subr.bf16.mxu1 %v1266_v9 }
  0x29   : > { %1202 = vmatpush3.bf16.msra.mxu0 %v1266_v9  ;;  %1250 = vmatpush3.bf16.msra.mxu1 %v1266_v9 }
  0x2c   : > { %1204 = vmatmul.mubr.bf16.vlgmr.msra.gmra.mxu0 %v1268_v10  ;;  %1220 = vmatmul.mubr.bf16.vlgmr.msra.gmra.mxu1 %v1276_v11 }
  0x2d   : > { %1207 = vmatprep.mubr.bf16.mxu0 %v1269_v12  ;;  %1223 = vmatprep.mubr.bf16.mxu1 %v1277_v13 }
  0x34   : > { %1208 = vmatmul.mubr.bf16.gmra.mxu0 %v1270_v14  ;;  %1224 = vmatmul.mubr.bf16.gmra.mxu1 %v1278_v15 }
  0x35   : > { %1211 = vmatprep.mubr.bf16.mxu0 %v1271_v16  ;;  %1227 = vmatprep.mubr.bf16.mxu1 %v1279_v17 }
  0x3c   : > { %1212 = vmatmul.mubr.bf16.gmra.mxu0 %v1272_v18  ;;  %1228 = vmatmul.mubr.bf16.gmra.mxu1 %v1280_v19 }
  0x3d   : > { %1215 = vmatprep.mubr.bf16.mxu0 %v1273_v20  ;;  %1231 = vmatprep.mubr.bf16.mxu1 %v1281_v21 }
  0x44   : > { %1216 = vmatmul.mubr.bf16.gmra.mxu0 %v1274_v22  ;;  %1232 = vmatmul.mubr.bf16.gmra.mxu1 %v1282_v23 }
  0xec   : > { %v1205_v24 = vpop.f32.mrf.mxu0  ;;  %v1377_v25 = vpop.f32.mrf.mxu1 }
  0xed   : > { %v775_v41 = vmul.f32 %v1205_v24, %v1205_v24 }
  0xee   : > { %v449_v26 = vpop.f32.mrf.mxu0  ;;  %v1379_v27 = vpop.f32.mrf.mxu1 }
  0xef   : > { %v773_v32 = vmul.f32 %v449_v26, %v449_v26 }
  0xf0   : > { %v1206_v28 = vpop.f32.mrf.mxu0  ;;  %v1388_v29 = vpop.f32.mrf.mxu1 }
  0xf1   : > { %v1076_v30 = vpack.c.bf16 %v1206_v28, %v1205_v24  ;;  %v1116_v31 = vpack.c.bf16 %v1388_v29, %v1377_v25  ;;  %v776_v46 = vmul.f32 %v1206_v28, %v1206_v28 }
  0xf2   : > { %v452_v33 = vpop.f32.mrf.mxu0  ;;  %v1392_v34 = vpop.f32.mrf.mxu1 }
  0xf3   : > { %1148 = vst [vmem:[%s1386_s14 + $0x8] sm:$0xff] %v1076_v30   ;;  %v1071_v35 = vpack.c.bf16 %v452_v33, %v449_v26  ;;  %v736_v36 = vadd.f32 %v452_v33, %v449_v26  ;;  %v774_v37 = vmul.f32 %v452_v33, %v452_v33  ;;  %1156 = vst [vmem:[%s1386_s14 + $0x48] sm:$0xff] %v1116_v31  }
  0xf4   : > { %v1111_v38 = vpack.c.bf16 %v1392_v34, %v1379_v27  ;;  %v1209_v39 = vpop.f32.mrf.mxu0  ;;  %v1398_v40 = vpop.f32.mrf.mxu1 }
  0xf5   : > { %1072 = vst [vmem:[%s1386_s14] sm:$0xff] %v1071_v35   ;;  %v737_v42 = vadd.f32 %v1205_v24, %v736_v36  ;;  %v805_v43 = vadd.f32 %v774_v37, %v773_v32  ;;  %v779_v1 = vmul.f32 %v1209_v39, %v1209_v39 }
  0xf6   : > { %1155 = vst [vmem:[%s1386_s14 + $0x40] sm:$0xff] %v1111_v38   ;;  %v465_v44 = vpop.f32.mrf.mxu0  ;;  %v1402_v45 = vpop.f32.mrf.mxu1 }
  0xf7   : > { %v806_v47 = vadd.f32 %v805_v43, %v775_v41  ;;  %v738_v48 = vadd.f32 %v1206_v28, %v737_v42  ;;  %v777_v52 = vmul.f32 %v465_v44, %v465_v44 }
  0xf8   : > { %v1210_v49 = vpop.f32.mrf.mxu0  ;;  %v1404_v50 = vpop.f32.mrf.mxu1 }
  0xf9   : > { %v739_v51 = vadd.f32 %v738_v48, %v465_v44  ;;  %v807_v53 = vadd.f32 %v806_v47, %v776_v46  ;;  %v1086_v54 = vpack.c.bf16 %v1210_v49, %v1209_v39  ;;  %v1126_v56 = vpack.c.bf16 %v1404_v50, %v1398_v40 }
  0xfa   : > { %v468_v55 = vpop.f32.mrf.mxu0  ;;  %v1408_v57 = vpop.f32.mrf.mxu1  ;;  %v780_v6 = vmul.f32 %v1210_v49, %v1210_v49 }
  0xfb   : > { %v808_v58 = vadd.f32 %v807_v53, %v777_v52  ;;  %1150 = vst [vmem:[%s1386_s14 + $0x18] sm:$0xff] %v1086_v54   ;;  %v1081_v59 = vpack.c.bf16 %v468_v55, %v465_v44  ;;  %v740_v60 = vadd.f32 %v739_v51, %v468_v55  ;;  %v778_v61 = vmul.f32 %v468_v55, %v468_v55 }
  0xfc   : > { %v1213_v62 = vpop.f32.mrf.mxu0  ;;  %1158 = vst [vmem:[%s1386_s14 + $0x58] sm:$0xff] %v1126_v56   ;;  %v1121_v63 = vpack.c.bf16 %v1408_v57, %v1402_v45  ;;  %v1414_v0 = vpop.f32.mrf.mxu1 }
  0xfd   : > { %1149 = vst [vmem:[%s1386_s14 + $0x10] sm:$0xff] %v1081_v59   ;;  %v741_v2 = vadd.f32 %v1209_v39, %v740_v60  ;;  %v809_v3 = vadd.f32 %v808_v58, %v778_v61  ;;  %v783_v26 = vmul.f32 %v1213_v62, %v1213_v62  ;;  %v789_v61 = vmul.f32 %v1379_v27, %v1379_v27 }
  0xfe   : > { %v481_v4 = vpop.f32.mrf.mxu0  ;;  %1157 = vst [vmem:[%s1386_s14 + $0x50] sm:$0xff] %v1121_v63   ;;  %v1418_v5 = vpop.f32.mrf.mxu1 }
  0xff   : > { %v810_v7 = vadd.f32 %v809_v3, %v779_v1  ;;  %v742_v8 = vadd.f32 %v1210_v49, %v741_v2  ;;  %v781_v12 = vmul.f32 %v481_v4, %v481_v4  ;;  %v790_v2 = vmul.f32 %v1392_v34, %v1392_v34 }
 0x100   : > { %v1214_v9 = vpop.f32.mrf.mxu0  ;;  %v1420_v10 = vpop.f32.mrf.mxu1 }
 0x101   : > { %v743_v11 = vadd.f32 %v742_v8, %v481_v4  ;;  %v811_v13 = vadd.f32 %v810_v7, %v780_v6  ;;  %v1096_v14 = vpack.c.bf16 %v1214_v9, %v1213_v62  ;;  %v1136_v16 = vpack.c.bf16 %v1420_v10, %v1414_v0 }
 0x102   : > { %v484_v15 = vpop.f32.mrf.mxu0  ;;  %v1424_v17 = vpop.f32.mrf.mxu1  ;;  %v784_v33 = vmul.f32 %v1214_v9, %v1214_v9  ;;  %v792_v8 = vmul.f32 %v1388_v29, %v1388_v29 }
 0x103   : > { %v812_v18 = vadd.f32 %v811_v13, %v781_v12  ;;  %1152 = vst [vmem:[%s1386_s14 + $0x28] sm:$0xff] %v1096_v14   ;;  %v1091_v19 = vpack.c.bf16 %v484_v15, %v481_v4  ;;  %v744_v20 = vadd.f32 %v743_v11, %v484_v15  ;;  %v782_v21 = vmul.f32 %v484_v15, %v484_v15 }
 0x104   : > { %v1217_v22 = vpop.f32.mrf.mxu0  ;;  %1160 = vst [vmem:[%s1386_s14 + $0x68] sm:$0xff] %v1136_v16   ;;  %v1131_v23 = vpack.c.bf16 %v1424_v17, %v1418_v5  ;;  %v1430_v24 = vpop.f32.mrf.mxu1  ;;  %v791_v4 = vmul.f32 %v1377_v25, %v1377_v25  ;;  %v793_v12 = vmul.f32 %v1402_v45, %v1402_v45  ;;  %v794_v15 = vmul.f32 %v1408_v57, %v1408_v57 }
 0x105   : > { %1151 = vst [vmem:[%s1386_s14 + $0x20] sm:$0xff] %v1091_v19   ;;  %v745_v28 = vadd.f32 %v1213_v62, %v744_v20  ;;  %v813_v30 = vadd.f32 %v812_v18, %v782_v21  ;;  %v787_v54 = vmul.f32 %v1217_v22, %v1217_v22  ;;  %v797_v21 = vmul.f32 %v1418_v5, %v1418_v5 }
 0x106   : > { %v497_v31 = vpop.f32.mrf.mxu0  ;;  %1159 = vst [vmem:[%s1386_s14 + $0x60] sm:$0xff] %v1131_v23   ;;  %v1434_v32 = vpop.f32.mrf.mxu1 }
 0x107   : > { %v814_v35 = vadd.f32 %v813_v30, %v783_v26  ;;  %v746_v36 = vadd.f32 %v1214_v9, %v745_v28  ;;  %v785_v41 = vmul.f32 %v497_v31, %v497_v31  ;;  %v798_v26 = vmul.f32 %v1424_v17, %v1424_v17 }
 0x108   : > { %v1218_v37 = vpop.f32.mrf.mxu0  ;;  %v1436_v38 = vpop.f32.mrf.mxu1 }
 0x109   : > { %v747_v39 = vadd.f32 %v746_v36, %v497_v31  ;;  %v815_v42 = vadd.f32 %v814_v35, %v784_v33  ;;  %v1106_v43 = vpack.c.bf16 %v1218_v37, %v1217_v22  ;;  %v1146_v46 = vpack.c.bf16 %v1436_v38, %v1430_v24 }
 0x10a   : > { %v500_v44 = vpop.f32.mrf.mxu0  ;;  %v564_v47 = vpop.f32.mrf.mxu1  ;;  %v788_v58 = vmul.f32 %v1218_v37, %v1218_v37  ;;  %v801_v35 = vmul.f32 %v1434_v32, %v1434_v32 }
 0x10b   : > { %v816_v48 = vadd.f32 %v815_v42, %v785_v41  ;;  %1154 = vst [vmem:[%s1386_s14 + $0x38] sm:$0xff] %v1106_v43   ;;  %v1101_v49 = vpack.c.bf16 %v500_v44, %v497_v31  ;;  %v748_v51 = vadd.f32 %v747_v39, %v500_v44  ;;  %v786_v52 = vmul.f32 %v500_v44, %v500_v44 }
 0x10c   : > { %1162 = vst [vmem:[%s1386_s14 + $0x78] sm:$0xff] %v1146_v46   ;;  %v1141_v53 = vpack.c.bf16 %v564_v47, %v1434_v32  ;;  %v802_v39 = vmul.f32 %v564_v47, %v564_v47  ;;  %v804_v43 = vmul.f32 %v1436_v38, %v1436_v38 }
 0x10d   : > { %1153 = vst [vmem:[%s1386_s14 + $0x30] sm:$0xff] %v1101_v49   ;;  %v749_v55 = vadd.f32 %v1217_v22, %v748_v51  ;;  %v817_v56 = vadd.f32 %v816_v48, %v786_v52  ;;  %v842_v48 = vlaneseq }
 0x10e   : > { %1161 = vst [vmem:[%s1386_s14 + $0x70] sm:$0xff] %v1141_v53  }
 0x10f   : > { %v750_v59 = vadd.f32 %v1218_v37, %v749_v55  ;;  %v818_v60 = vadd.f32 %v817_v56, %v787_v54  ;;  %v843_v53 = vshrl.u32 %v842_v48, 7 }
 0x111   : > { %v819_v62 = vadd.f32 %v818_v60, %v788_v58  ;;  %v751_v63 = vadd.f32 %v750_v59, %v1379_v27  ;;  %vm844_vm0 = vcmp.eq.s32.totalorder %v843_v53, 0 }
 0x113   : > { %v752_v1 = vadd.f32 %v751_v63, %v1392_v34  ;;  %v820_v3 = vadd.f32 %v819_v62, %v789_v61 }
 0x115   : > { %v753_v6 = vadd.f32 %v1377_v25, %v752_v1  ;;  %v821_v7 = vadd.f32 %v820_v3, %v790_v2  ;;  %v795_v25 = vmul.f32 %v1398_v40, %v1398_v40 }
 0x117   : > { %v822_v9 = vadd.f32 %v821_v7, %v791_v4  ;;  %v754_v11 = vadd.f32 %v1388_v29, %v753_v6  ;;  %v796_v29 = vmul.f32 %v1404_v50, %v1404_v50 }
 0x119   : > { %v755_v27 = vadd.f32 %v754_v11, %v1402_v45  ;;  %v823_v13 = vadd.f32 %v822_v9, %v792_v8 }
 0x11b   : > { %v824_v34 = vadd.f32 %v823_v13, %v793_v12  ;;  %v756_v14 = vadd.f32 %v755_v27, %v1408_v57 }
 0x11d   : > { %v757_v16 = vadd.f32 %v1398_v40, %v756_v14  ;;  %v825_v18 = vadd.f32 %v824_v34, %v794_v15  ;;  %v799_v40 = vmul.f32 %v1414_v0, %v1414_v0 }
 0x11f   : > { %v826_v19 = vadd.f32 %v825_v18, %v795_v25  ;;  %v758_v20 = vadd.f32 %v1404_v50, %v757_v16  ;;  %v800_v50 = vmul.f32 %v1420_v10, %v1420_v10 }
 0x121   : > { %v759_v45 = vadd.f32 %v758_v20, %v1418_v5  ;;  %v827_v22 = vadd.f32 %v826_v19, %v796_v29 }
 0x123   : > { %v828_v23 = vadd.f32 %v827_v22, %v797_v21  ;;  %v760_v57 = vadd.f32 %v759_v45, %v1424_v17 }
 0x125   : > { %v761_v28 = vadd.f32 %v1414_v0, %v760_v57  ;;  %v829_v30 = vadd.f32 %v828_v23, %v798_v26  ;;  %v803_v0 = vmul.f32 %v1430_v24, %v1430_v24 }
 0x127   : > { %v830_v31 = vadd.f32 %v829_v30, %v799_v40  ;;  %v762_v5 = vadd.f32 %v1420_v10, %v761_v28 }
 0x129   : > { %v763_v33 = vadd.f32 %v762_v5, %v1434_v32  ;;  %v831_v36 = vadd.f32 %v830_v31, %v800_v50 }
 0x12b   : > { %v832_v17 = vadd.f32 %v831_v36, %v801_v35  ;;  %v764_v37 = vadd.f32 %v763_v33, %v564_v47 }
 0x12d   : > { %v765_v41 = vadd.f32 %v1430_v24, %v764_v37  ;;  %v833_v42 = vadd.f32 %v832_v17, %v802_v39 }
 0x12f   : > { %v766_v10 = vadd.f32 %v1436_v38, %v765_v41  ;;  %v834_v44 = vadd.f32 %v833_v42, %v803_v0 }
 0x131   : > { %v767_v46 = vrot.slane %v766_v10, 4  ;;  %v835_v32 = vadd.f32 %v834_v44, %v804_v43 }
 0x133   : > { %v768_v49 = vadd.f32 %v767_v46, %v766_v10  ;;  %v836_v51 = vrot.slane %v835_v32, 4 }
 0x135   : > { %v769_v47 = vrot.slane %v768_v49, 2  ;;  %v837_v52 = vadd.f32 %v836_v51, %v835_v32 }
 0x137   : > { %v770_v54 = vadd.f32 %v769_v47, %v768_v49  ;;  %v838_v55 = vrot.slane %v837_v52, 2 }
 0x139   : > { %v771_v24 = vrot.slane %v770_v54, 1  ;;  %v839_v56 = vadd.f32 %v838_v55, %v837_v52 }
 0x13b   : > { %v772_v38 = vadd.f32 %v771_v24, %v770_v54  ;;  %v840_v58 = vrot.slane %v839_v56, 1 }
 0x13d   : > { %v841_v59 = vadd.f32 %v840_v58, %v839_v56  ;;  %v845_v60 = vsel %vm844_vm0, %v772_v38, 0.0 }
 0x13e   : > { %846 = vst [vmem:[%s217_s20] sm:$0xff] %v845_v60 }
 0x13f   : > { %v847_v61 = vsel %vm844_vm0, %v841_v59, 0.0 }
 0x140   : > { %848 = vst [vmem:[%s221_s23] sm:$0xff] %v847_v61 }
 0x141 PF: > { %s15_s15 = sadd.s32 1, %s1289_s15  }
 0x142   : > { %p12_p5 = scmp.ge.s32.totalorder %s15_s15, 4  }
 0x144   :  { %14 = sbr.rel (!%p12_p5) target bundleno = 1 (0x1), region = 82 }

// kernel: basic_block_forward.11
= control target key start
LH: loop header
LB: loop body
LE: loop exit
PB: predicated region body
PF: predicated region fallthrough
CT: control target
= control target key end

     0   :  { %s1502_s0 = inlined_call_operand.vmem [shape: bf16[512,128], index: 0, kind: input, shape index: {}]   ;;  %s1503_s1 = inlined_call_operand.vmem [shape: f32[1,128], index: 1, kind: input, shape index: {}]   ;;  %s1504_s2 = inlined_call_operand.vmem [shape: f32[1,128], index: 2, kind: input, shape index: {}]   ;;  %s1505_s3 = inlined_call_operand.vmem [shape: bf16[512,128], index: 3, kind: output, shape index: {}]  }
   0x1   :  { %v803_v0 = vld [vmem:[%s1502_s0] sm:$0xff]   ;;  %v1090_v4 = vld [vmem:[%s1502_s0 + $0x8] sm:$0xff]   ;;  %v1091_v5 = vld [vmem:[%s1502_s0 + $0x10] sm:$0xff]  }
   0x2   :  { %v1178_v1 = vld [vmem:[%s1503_s1] ss:$0 sm:$0xff]  ;;  %v804_v2 = vunpack.c.l.bf16 %v803_v0  ;;  %v805_v3 = vunpack.c.h.bf16 %v803_v0  ;;  %v1092_v6 = vld [vmem:[%s1502_s0 + $0x18] sm:$0xff]   ;;  %v808_v8 = vunpack.c.l.bf16 %v1090_v4  ;;  %v809_v9 = vunpack.c.h.bf16 %v1090_v4  ;;  %v1094_v33 = vld [vmem:[%s1502_s0 + $0x28] sm:$0xff]  }
   0x3   :  { %v1192_v7 = vld [vmem:[%s1504_s2] ss:$0 sm:$0xff]  ;;  %v812_v10 = vunpack.c.l.bf16 %v1091_v5  ;;  %v813_v11 = vunpack.c.h.bf16 %v1091_v5  ;;  %v816_v14 = vunpack.c.l.bf16 %v1092_v6  ;;  %v817_v15 = vunpack.c.h.bf16 %v1092_v6  ;;  %v1095_v38 = vld [vmem:[%s1502_s0 + $0x30] sm:$0xff]   ;;  %v1096_v43 = vld [vmem:[%s1502_s0 + $0x38] sm:$0xff]  }
   0x4   :  { %v149_v12 = vmul.f32 %v804_v2, %v1178_v1  ;;  %v150_v13 = vmul.f32 %v805_v3, %v1178_v1  ;;  %v151_v16 = vmul.f32 %v808_v8, %v1178_v1  ;;  %v152_v17 = vmul.f32 %v809_v9, %v1178_v1  ;;  %v1093_v28 = vld [vmem:[%s1502_s0 + $0x20] sm:$0xff]  }
   0x5   :  { %v153_v18 = vmul.f32 %v812_v10, %v1178_v1  ;;  %v154_v19 = vmul.f32 %v813_v11, %v1178_v1  ;;  %v155_v22 = vmul.f32 %v816_v14, %v1178_v1  ;;  %v156_v23 = vmul.f32 %v817_v15, %v1178_v1  ;;  %v1097_v0 = vld [vmem:[%s1502_s0 + $0x40] sm:$0xff]   ;;  %v1098_v11 = vld [vmem:[%s1502_s0 + $0x48] sm:$0xff]  }
   0x6   :  { %v220_v20 = vadd.f32 %v1192_v7, %v149_v12  ;;  %v221_v21 = vadd.f32 %v1192_v7, %v150_v13  ;;  %v222_v24 = vadd.f32 %v1192_v7, %v151_v16  ;;  %v223_v25 = vadd.f32 %v1192_v7, %v152_v17  ;;  %v1099_v16 = vld [vmem:[%s1502_s0 + $0x50] sm:$0xff]  }
   0x7   :  { %v224_v26 = vadd.f32 %v1192_v7, %v153_v18  ;;  %v225_v27 = vadd.f32 %v1192_v7, %v154_v19  ;;  %v226_v31 = vadd.f32 %v1192_v7, %v155_v22  ;;  %v227_v32 = vadd.f32 %v1192_v7, %v156_v23 }
   0x8   :  { %v284_v29 = vmax.f32 %v220_v20, 0.0  ;;  %v285_v30 = vmax.f32 %v221_v21, 0.0  ;;  %v286_v34 = vmax.f32 %v222_v24, 0.0  ;;  %v287_v35 = vmax.f32 %v223_v25, 0.0  ;;  %v1100_v25 = vld [vmem:[%s1502_s0 + $0x58] sm:$0xff]  }
   0x9   :  { %v288_v36 = vmax.f32 %v224_v26, 0.0  ;;  %v289_v37 = vmax.f32 %v225_v27, 0.0  ;;  %v290_v40 = vmax.f32 %v226_v31, 0.0  ;;  %v291_v41 = vmax.f32 %v227_v32, 0.0 }
   0xa   :  { %v933_v39 = vpack.c.bf16 %v285_v30, %v284_v29  ;;  %v820_v42 = vunpack.c.l.bf16 %v1093_v28  ;;  %v938_v44 = vpack.c.bf16 %v287_v35, %v286_v34  ;;  %v821_v46 = vunpack.c.h.bf16 %v1093_v28 }
   0xb   :  { %v943_v45 = vpack.c.bf16 %v289_v37, %v288_v36  ;;  %v824_v47 = vunpack.c.l.bf16 %v1094_v33  ;;  %v948_v48 = vpack.c.bf16 %v291_v41, %v290_v40  ;;  %v825_v50 = vunpack.c.h.bf16 %v1094_v33 }
   0xc   :  { %934 = vst [vmem:[%s1505_s3] sm:$0xff] %v933_v39   ;;  %v157_v49 = vmul.f32 %v820_v42, %v1178_v1  ;;  %v828_v51 = vunpack.c.l.bf16 %v1095_v38  ;;  %1121 = vst [vmem:[%s1505_s3 + $0x8] sm:$0xff] %v938_v44   ;;  %v158_v52 = vmul.f32 %v821_v46, %v1178_v1  ;;  %v829_v54 = vunpack.c.h.bf16 %v1095_v38  ;;  %v1101_v38 = vld [vmem:[%s1502_s0 + $0x60] sm:$0xff]  }
   0xd   :  { %1122 = vst [vmem:[%s1505_s3 + $0x10] sm:$0xff] %v943_v45   ;;  %v159_v53 = vmul.f32 %v824_v47, %v1178_v1  ;;  %v832_v55 = vunpack.c.l.bf16 %v1096_v43  ;;  %1123 = vst [vmem:[%s1505_s3 + $0x18] sm:$0xff] %v948_v48   ;;  %v160_v57 = vmul.f32 %v825_v50, %v1178_v1  ;;  %v833_v59 = vunpack.c.h.bf16 %v1096_v43 }
   0xe   :  { %v228_v56 = vadd.f32 %v1192_v7, %v157_v49  ;;  %v161_v58 = vmul.f32 %v828_v51, %v1178_v1  ;;  %v229_v60 = vadd.f32 %v1192_v7, %v158_v52  ;;  %v162_v62 = vmul.f32 %v829_v54, %v1178_v1  ;;  %v1102_v51 = vld [vmem:[%s1502_s0 + $0x68] sm:$0xff]  }
   0xf   :  { %v230_v61 = vadd.f32 %v1192_v7, %v159_v53  ;;  %v163_v63 = vmul.f32 %v832_v55, %v1178_v1  ;;  %v231_v3 = vadd.f32 %v1192_v7, %v160_v57  ;;  %v164_v5 = vmul.f32 %v833_v59, %v1178_v1 }
  0x10   :  { %v292_v2 = vmax.f32 %v228_v56, 0.0  ;;  %v232_v4 = vadd.f32 %v1192_v7, %v161_v58  ;;  %v293_v6 = vmax.f32 %v229_v60, 0.0  ;;  %v233_v9 = vadd.f32 %v1192_v7, %v162_v62  ;;  %v1103_v60 = vld [vmem:[%s1502_s0 + $0x70] sm:$0xff]  }
  0x11   :  { %v294_v8 = vmax.f32 %v230_v61, 0.0  ;;  %v234_v10 = vadd.f32 %v1192_v7, %v163_v63  ;;  %v295_v12 = vmax.f32 %v231_v3, 0.0  ;;  %v235_v14 = vadd.f32 %v1192_v7, %v164_v5 }
  0x12   :  { %v296_v13 = vmax.f32 %v232_v4, 0.0  ;;  %v836_v15 = vunpack.c.l.bf16 %v1097_v0  ;;  %v953_v17 = vpack.c.bf16 %v293_v6, %v292_v2  ;;  %v297_v18 = vmax.f32 %v233_v9, 0.0  ;;  %v1104_v2 = vld [vmem:[%s1502_s0 + $0x78] sm:$0xff]  }
  0x13   :  { %v298_v19 = vmax.f32 %v234_v10, 0.0  ;;  %v837_v20 = vunpack.c.h.bf16 %v1097_v0  ;;  %v958_v21 = vpack.c.bf16 %v295_v12, %v294_v8  ;;  %v299_v22 = vmax.f32 %v235_v14, 0.0  ;;  %v1105_v12 = vld [vmem:[%s1502_s0 + $0x80] sm:$0xff]  }
  0x14   :  { %v165_v23 = vmul.f32 %v836_v15, %v1178_v1  ;;  %v840_v24 = vunpack.c.l.bf16 %v1098_v11  ;;  %1124 = vst [vmem:[%s1505_s3 + $0x20] sm:$0xff] %v953_v17   ;;  %v963_v26 = vpack.c.bf16 %v297_v18, %v296_v13  ;;  %v841_v28 = vunpack.c.h.bf16 %v1098_v11 }
  0x15   :  { %v166_v27 = vmul.f32 %v837_v20, %v1178_v1  ;;  %v844_v29 = vunpack.c.l.bf16 %v1099_v16  ;;  %1125 = vst [vmem:[%s1505_s3 + $0x28] sm:$0xff] %v958_v21   ;;  %v968_v30 = vpack.c.bf16 %v299_v22, %v298_v19  ;;  %v845_v33 = vunpack.c.h.bf16 %v1099_v16 }
  0x16   :  { %v236_v31 = vadd.f32 %v1192_v7, %v165_v23  ;;  %v167_v32 = vmul.f32 %v840_v24, %v1178_v1  ;;  %1126 = vst [vmem:[%s1505_s3 + $0x30] sm:$0xff] %v963_v26   ;;  %v168_v35 = vmul.f32 %v841_v28, %v1178_v1  ;;  %v848_v37 = vunpack.c.l.bf16 %v1100_v25 }
  0x17   :  { %v237_v34 = vadd.f32 %v1192_v7, %v166_v27  ;;  %v169_v36 = vmul.f32 %v844_v29, %v1178_v1  ;;  %1127 = vst [vmem:[%s1505_s3 + $0x38] sm:$0xff] %v968_v30   ;;  %v170_v41 = vmul.f32 %v845_v33, %v1178_v1  ;;  %v849_v42 = vunpack.c.h.bf16 %v1100_v25  ;;  %v1106_v29 = vld [vmem:[%s1502_s0 + $0x88] sm:$0xff]  }
  0x18   :  { %v300_v39 = vmax.f32 %v236_v31, 0.0  ;;  %v238_v40 = vadd.f32 %v1192_v7, %v167_v32  ;;  %v239_v44 = vadd.f32 %v1192_v7, %v168_v35  ;;  %v171_v46 = vmul.f32 %v848_v37, %v1178_v1 }
  0x19   :  { %v301_v43 = vmax.f32 %v237_v34, 0.0  ;;  %v240_v45 = vadd.f32 %v1192_v7, %v169_v36  ;;  %v241_v48 = vadd.f32 %v1192_v7, %v170_v41  ;;  %v172_v49 = vmul.f32 %v849_v42, %v1178_v1  ;;  %v1107_v34 = vld [vmem:[%s1502_s0 + $0x90] sm:$0xff]  }
  0x1a   :  { %v302_v47 = vmax.f32 %v238_v40, 0.0  ;;  %v852_v50 = vunpack.c.l.bf16 %v1101_v38  ;;  %v303_v53 = vmax.f32 %v239_v44, 0.0  ;;  %v242_v55 = vadd.f32 %v1192_v7, %v171_v46 }
  0x1b   :  { %v973_v52 = vpack.c.bf16 %v301_v43, %v300_v39  ;;  %v304_v54 = vmax.f32 %v240_v45, 0.0  ;;  %v305_v56 = vmax.f32 %v241_v48, 0.0  ;;  %v243_v57 = vadd.f32 %v1192_v7, %v172_v49  ;;  %v1108_v43 = vld [vmem:[%s1502_s0 + $0x98] sm:$0xff]  }
  0x1c   :  { %v853_v58 = vunpack.c.h.bf16 %v1101_v38  ;;  %v173_v59 = vmul.f32 %v852_v50, %v1178_v1  ;;  %v978_v61 = vpack.c.bf16 %v303_v53, %v302_v47  ;;  %v306_v62 = vmax.f32 %v242_v55, 0.0 }
  0x1d   :  { %1128 = vst [vmem:[%s1505_s3 + $0x40] sm:$0xff] %v973_v52   ;;  %v856_v63 = vunpack.c.l.bf16 %v1102_v51  ;;  %v857_v0 = vunpack.c.h.bf16 %v1102_v51  ;;  %v983_v3 = vpack.c.bf16 %v305_v56, %v304_v54  ;;  %v307_v4 = vmax.f32 %v243_v57, 0.0  ;;  %v1109_v56 = vld [vmem:[%s1502_s0 + $0xa0] sm:$0xff]  }
  0x1e   :  { %v174_v5 = vmul.f32 %v853_v58, %v1178_v1  ;;  %v244_v6 = vadd.f32 %v1192_v7, %v173_v59  ;;  %1129 = vst [vmem:[%s1505_s3 + $0x48] sm:$0xff] %v978_v61   ;;  %v860_v10 = vunpack.c.l.bf16 %v1103_v60  ;;  %v861_v11 = vunpack.c.h.bf16 %v1103_v60 }
  0x1f   :  { %v175_v8 = vmul.f32 %v856_v63, %v1178_v1  ;;  %v176_v9 = vmul.f32 %v857_v0, %v1178_v1  ;;  %1130 = vst [vmem:[%s1505_s3 + $0x50] sm:$0xff] %v983_v3   ;;  %v988_v13 = vpack.c.bf16 %v307_v4, %v306_v62  ;;  %v864_v16 = vunpack.c.l.bf16 %v1104_v2 }
  0x20   :  { %v245_v14 = vadd.f32 %v1192_v7, %v174_v5  ;;  %v308_v15 = vmax.f32 %v244_v6, 0.0  ;;  %v177_v19 = vmul.f32 %v860_v10, %v1178_v1  ;;  %v178_v20 = vmul.f32 %v861_v11, %v1178_v1 }
  0x21   :  { %v246_v17 = vadd.f32 %v1192_v7, %v175_v8  ;;  %v247_v18 = vadd.f32 %v1192_v7, %v176_v9  ;;  %1131 = vst [vmem:[%s1505_s3 + $0x58] sm:$0xff] %v988_v13   ;;  %v865_v22 = vunpack.c.h.bf16 %v1104_v2  ;;  %v179_v23 = vmul.f32 %v864_v16, %v1178_v1  ;;  %v1110_v2 = vld [vmem:[%s1502_s0 + $0xa8] sm:$0xff]   ;;  %v1111_v16 = vld [vmem:[%s1502_s0 + $0xb0] sm:$0xff]  }
  0x22   :  { %v309_v21 = vmax.f32 %v245_v14, 0.0  ;;  %v868_v24 = vunpack.c.l.bf16 %v1105_v12  ;;  %v248_v27 = vadd.f32 %v1192_v7, %v177_v19  ;;  %v249_v28 = vadd.f32 %v1192_v7, %v178_v20 }
  0x23   :  { %v310_v25 = vmax.f32 %v246_v17, 0.0  ;;  %v311_v26 = vmax.f32 %v247_v18, 0.0  ;;  %v180_v31 = vmul.f32 %v865_v22, %v1178_v1  ;;  %v250_v32 = vadd.f32 %v1192_v7, %v179_v23 }
  0x24   :  { %v993_v30 = vpack.c.bf16 %v309_v21, %v308_v15  ;;  %v869_v33 = vunpack.c.h.bf16 %v1105_v12  ;;  %v312_v36 = vmax.f32 %v248_v27, 0.0  ;;  %v313_v37 = vmax.f32 %v249_v28, 0.0  ;;  %v1112_v21 = vld [vmem:[%s1502_s0 + $0xb8] sm:$0xff]  }
  0x25   :  { %v998_v35 = vpack.c.bf16 %v311_v26, %v310_v25  ;;  %v181_v38 = vmul.f32 %v868_v24, %v1178_v1  ;;  %v251_v39 = vadd.f32 %v1192_v7, %v180_v31  ;;  %v314_v40 = vmax.f32 %v250_v32, 0.0 }
  0x26   :  { %1132 = vst [vmem:[%s1505_s3 + $0x60] sm:$0xff] %v993_v30   ;;  %v182_v41 = vmul.f32 %v869_v33, %v1178_v1  ;;  %v872_v42 = vunpack.c.l.bf16 %v1106_v29  ;;  %v1003_v44 = vpack.c.bf16 %v313_v37, %v312_v36  ;;  %v873_v46 = vunpack.c.h.bf16 %v1106_v29 }
  0x27   :  { %1133 = vst [vmem:[%s1505_s3 + $0x68] sm:$0xff] %v998_v35   ;;  %v252_v45 = vadd.f32 %v1192_v7, %v181_v38  ;;  %v876_v47 = vunpack.c.l.bf16 %v1107_v34  ;;  %v315_v48 = vmax.f32 %v251_v39, 0.0  ;;  %v877_v51 = vunpack.c.h.bf16 %v1107_v34  ;;  %v1113_v34 = vld [vmem:[%s1502_s0 + $0xc0] sm:$0xff]  }
  0x28   :  { %v253_v49 = vadd.f32 %v1192_v7, %v182_v41  ;;  %v183_v50 = vmul.f32 %v872_v42, %v1178_v1  ;;  %1134 = vst [vmem:[%s1505_s3 + $0x70] sm:$0xff] %v1003_v44   ;;  %v184_v53 = vmul.f32 %v873_v46, %v1178_v1  ;;  %v880_v55 = vunpack.c.l.bf16 %v1108_v43 }
  0x29   :  { %v316_v52 = vmax.f32 %v252_v45, 0.0  ;;  %v185_v54 = vmul.f32 %v876_v47, %v1178_v1  ;;  %v1008_v57 = vpack.c.bf16 %v315_v48, %v314_v40  ;;  %v186_v60 = vmul.f32 %v877_v51, %v1178_v1  ;;  %v1114_v47 = vld [vmem:[%s1502_s0 + $0xc8] sm:$0xff]  }
  0x2a   :  { %v317_v58 = vmax.f32 %v253_v49, 0.0  ;;  %v254_v59 = vadd.f32 %v1192_v7, %v183_v50  ;;  %v255_v61 = vadd.f32 %v1192_v7, %v184_v53  ;;  %v881_v63 = vunpack.c.h.bf16 %v1108_v43 }
  0x2b   :  { %v256_v62 = vadd.f32 %v1192_v7, %v185_v54  ;;  %v187_v0 = vmul.f32 %v880_v55, %v1178_v1  ;;  %1135 = vst [vmem:[%s1505_s3 + $0x78] sm:$0xff] %v1008_v57   ;;  %v257_v5 = vadd.f32 %v1192_v7, %v186_v60  ;;  %v884_v6 = vunpack.c.l.bf16 %v1109_v56 }
  0x2c   :  { %v1013_v3 = vpack.c.bf16 %v317_v58, %v316_v52  ;;  %v318_v4 = vmax.f32 %v254_v59, 0.0  ;;  %v319_v8 = vmax.f32 %v255_v61, 0.0  ;;  %v188_v10 = vmul.f32 %v881_v63, %v1178_v1  ;;  %v1115_v52 = vld [vmem:[%s1502_s0 + $0xd0] sm:$0xff]   ;;  %v1116_v61 = vld [vmem:[%s1502_s0 + $0xd8] sm:$0xff]  }
  0x2d   :  { %v320_v9 = vmax.f32 %v256_v62, 0.0  ;;  %v258_v11 = vadd.f32 %v1192_v7, %v187_v0  ;;  %v321_v12 = vmax.f32 %v257_v5, 0.0  ;;  %v885_v13 = vunpack.c.h.bf16 %v1109_v56 }
  0x2e   :  { %1136 = vst [vmem:[%s1505_s3 + $0x80] sm:$0xff] %v1013_v3   ;;  %v189_v14 = vmul.f32 %v884_v6, %v1178_v1  ;;  %v888_v15 = vunpack.c.l.bf16 %v1110_v2  ;;  %v1018_v17 = vpack.c.bf16 %v319_v8, %v318_v4  ;;  %v259_v18 = vadd.f32 %v1192_v7, %v188_v10 }
  0x2f   :  { %v322_v19 = vmax.f32 %v258_v11, 0.0  ;;  %v889_v20 = vunpack.c.h.bf16 %v1110_v2  ;;  %v1023_v22 = vpack.c.bf16 %v321_v12, %v320_v9  ;;  %v190_v23 = vmul.f32 %v885_v13, %v1178_v1  ;;  %v1117_v12 = vld [vmem:[%s1502_s0 + $0xe0] sm:$0xff]  }
  0x30   :  { %v260_v24 = vadd.f32 %v1192_v7, %v189_v14  ;;  %v191_v25 = vmul.f32 %v888_v15, %v1178_v1  ;;  %1137 = vst [vmem:[%s1505_s3 + $0x88] sm:$0xff] %v1018_v17   ;;  %v323_v26 = vmax.f32 %v259_v18, 0.0  ;;  %v892_v28 = vunpack.c.l.bf16 %v1111_v16 }
  0x31   :  { %v192_v27 = vmul.f32 %v889_v20, %v1178_v1  ;;  %v893_v29 = vunpack.c.h.bf16 %v1111_v16  ;;  %1138 = vst [vmem:[%s1505_s3 + $0x90] sm:$0xff] %v1023_v22   ;;  %v261_v30 = vadd.f32 %v1192_v7, %v190_v23  ;;  %v896_v33 = vunpack.c.l.bf16 %v1112_v21 }
  0x32   :  { %v324_v31 = vmax.f32 %v260_v24, 0.0  ;;  %v262_v32 = vadd.f32 %v1192_v7, %v191_v25  ;;  %v1028_v35 = vpack.c.bf16 %v323_v26, %v322_v19  ;;  %v193_v37 = vmul.f32 %v892_v28, %v1178_v1 }
  0x33   :  { %v263_v36 = vadd.f32 %v1192_v7, %v192_v27  ;;  %v194_v38 = vmul.f32 %v893_v29, %v1178_v1  ;;  %v325_v39 = vmax.f32 %v261_v30, 0.0  ;;  %v897_v41 = vunpack.c.h.bf16 %v1112_v21  ;;  %v1118_v21 = vld [vmem:[%s1502_s0 + $0xe8] sm:$0xff]  }
  0x34   :  { %v326_v40 = vmax.f32 %v262_v32, 0.0  ;;  %v195_v42 = vmul.f32 %v896_v33, %v1178_v1  ;;  %1139 = vst [vmem:[%s1505_s3 + $0x98] sm:$0xff] %v1028_v35   ;;  %v264_v44 = vadd.f32 %v1192_v7, %v193_v37  ;;  %v900_v46 = vunpack.c.l.bf16 %v1113_v34 }
  0x35   :  { %v327_v43 = vmax.f32 %v263_v36, 0.0  ;;  %v265_v45 = vadd.f32 %v1192_v7, %v194_v38  ;;  %v1033_v48 = vpack.c.bf16 %v325_v39, %v324_v31  ;;  %v196_v49 = vmul.f32 %v897_v41, %v1178_v1  ;;  %v1120_v39 = vld [vmem:[%s1502_s0 + $0xf8] sm:$0xff]  }
  0x36   :  { %v266_v50 = vadd.f32 %v1192_v7, %v195_v42  ;;  %v901_v51 = vunpack.c.h.bf16 %v1113_v34  ;;  %v328_v54 = vmax.f32 %v264_v44, 0.0  ;;  %v197_v56 = vmul.f32 %v900_v46, %v1178_v1  ;;  %v1119_v34 = vld [vmem:[%s1502_s0 + $0xf0] sm:$0xff]  }
  0x37   :  { %v1038_v53 = vpack.c.bf16 %v327_v43, %v326_v40  ;;  %v329_v55 = vmax.f32 %v265_v45, 0.0  ;;  %1140 = vst [vmem:[%s1505_s3 + $0xa0] sm:$0xff] %v1033_v48   ;;  %v267_v57 = vadd.f32 %v1192_v7, %v196_v49  ;;  %v904_v60 = vunpack.c.l.bf16 %v1114_v47 }
  0x38   :  { %v330_v58 = vmax.f32 %v266_v50, 0.0  ;;  %v198_v59 = vmul.f32 %v901_v51, %v1178_v1  ;;  %v268_v63 = vadd.f32 %v1192_v7, %v197_v56  ;;  %v905_v0 = vunpack.c.h.bf16 %v1114_v47 }
  0x39   :  { %1141 = vst [vmem:[%s1505_s3 + $0xa8] sm:$0xff] %v1038_v53   ;;  %v1043_v62 = vpack.c.bf16 %v329_v55, %v328_v54  ;;  %v908_v2 = vunpack.c.l.bf16 %v1115_v52  ;;  %v331_v3 = vmax.f32 %v267_v57, 0.0  ;;  %v199_v5 = vmul.f32 %v904_v60, %v1178_v1 }
  0x3a   :  { %v269_v4 = vadd.f32 %v1192_v7, %v198_v59  ;;  %v909_v6 = vunpack.c.h.bf16 %v1115_v52  ;;  %v332_v8 = vmax.f32 %v268_v63, 0.0  ;;  %v200_v9 = vmul.f32 %v905_v0, %v1178_v1 }
  0x3b   :  { %1142 = vst [vmem:[%s1505_s3 + $0xb0] sm:$0xff] %v1043_v62   ;;  %v201_v10 = vmul.f32 %v908_v2, %v1178_v1  ;;  %v912_v11 = vunpack.c.l.bf16 %v1116_v61  ;;  %v1048_v13 = vpack.c.bf16 %v331_v3, %v330_v58  ;;  %v270_v15 = vadd.f32 %v1192_v7, %v199_v5 }
  0x3c   :  { %v333_v14 = vmax.f32 %v269_v4, 0.0  ;;  %v202_v16 = vmul.f32 %v909_v6, %v1178_v1  ;;  %v271_v17 = vadd.f32 %v1192_v7, %v200_v9  ;;  %v913_v19 = vunpack.c.h.bf16 %v1116_v61 }
  0x3d   :  { %v272_v18 = vadd.f32 %v1192_v7, %v201_v10  ;;  %v203_v20 = vmul.f32 %v912_v11, %v1178_v1  ;;  %1143 = vst [vmem:[%s1505_s3 + $0xb8] sm:$0xff] %v1048_v13   ;;  %v334_v23 = vmax.f32 %v270_v15, 0.0  ;;  %v916_v25 = vunpack.c.l.bf16 %v1117_v12 }
  0x3e   :  { %v1053_v22 = vpack.c.bf16 %v333_v14, %v332_v8  ;;  %v273_v24 = vadd.f32 %v1192_v7, %v202_v16  ;;  %v335_v26 = vmax.f32 %v271_v17, 0.0  ;;  %v204_v28 = vmul.f32 %v913_v19, %v1178_v1 }
  0x3f   :  { %v336_v27 = vmax.f32 %v272_v18, 0.0  ;;  %v274_v29 = vadd.f32 %v1192_v7, %v203_v20  ;;  %v917_v31 = vunpack.c.h.bf16 %v1117_v12  ;;  %v205_v32 = vmul.f32 %v916_v25, %v1178_v1 }
  0x40   :  { %1144 = vst [vmem:[%s1505_s3 + $0xc0] sm:$0xff] %v1053_v22   ;;  %v337_v30 = vmax.f32 %v273_v24, 0.0  ;;  %v920_v33 = vunpack.c.l.bf16 %v1118_v21  ;;  %v1058_v35 = vpack.c.bf16 %v335_v26, %v334_v23  ;;  %v275_v36 = vadd.f32 %v1192_v7, %v204_v28 }
  0x41   :  { %v338_v37 = vmax.f32 %v274_v29, 0.0  ;;  %v921_v38 = vunpack.c.h.bf16 %v1118_v21  ;;  %v206_v41 = vmul.f32 %v917_v31, %v1178_v1  ;;  %v276_v42 = vadd.f32 %v1192_v7, %v205_v32 }
  0x42   :  { %v1063_v40 = vpack.c.bf16 %v337_v30, %v336_v27  ;;  %v207_v43 = vmul.f32 %v920_v33, %v1178_v1  ;;  %1145 = vst [vmem:[%s1505_s3 + $0xc8] sm:$0xff] %v1058_v35   ;;  %v339_v44 = vmax.f32 %v275_v36, 0.0  ;;  %v924_v46 = vunpack.c.l.bf16 %v1119_v34 }
  0x43   :  { %v208_v45 = vmul.f32 %v921_v38, %v1178_v1  ;;  %v925_v47 = vunpack.c.h.bf16 %v1119_v34  ;;  %v277_v48 = vadd.f32 %v1192_v7, %v206_v41  ;;  %v340_v49 = vmax.f32 %v276_v42, 0.0 }
  0x44   :  { %1146 = vst [vmem:[%s1505_s3 + $0xd0] sm:$0xff] %v1063_v40   ;;  %v278_v50 = vadd.f32 %v1192_v7, %v207_v43  ;;  %v928_v51 = vunpack.c.l.bf16 %v1120_v39  ;;  %v1068_v52 = vpack.c.bf16 %v339_v44, %v338_v37  ;;  %v209_v54 = vmul.f32 %v924_v46, %v1178_v1 }
  0x45   :  { %v279_v53 = vadd.f32 %v1192_v7, %v208_v45  ;;  %v210_v55 = vmul.f32 %v925_v47, %v1178_v1  ;;  %v341_v56 = vmax.f32 %v277_v48, 0.0  ;;  %v929_v58 = vunpack.c.h.bf16 %v1120_v39 }
  0x46   :  { %v342_v57 = vmax.f32 %v278_v50, 0.0  ;;  %v211_v59 = vmul.f32 %v928_v51, %v1178_v1  ;;  %1147 = vst [vmem:[%s1505_s3 + $0xd8] sm:$0xff] %v1068_v52   ;;  %v280_v61 = vadd.f32 %v1192_v7, %v209_v54 }
  0x47   :  { %v343_v60 = vmax.f32 %v279_v53, 0.0  ;;  %v281_v62 = vadd.f32 %v1192_v7, %v210_v55  ;;  %v1073_v63 = vpack.c.bf16 %v341_v56, %v340_v49  ;;  %v212_v0 = vmul.f32 %v929_v58, %v1178_v1 }
  0x48   :  { %v282_v2 = vadd.f32 %v1192_v7, %v211_v59  ;;  %v344_v4 = vmax.f32 %v280_v61, 0.0 }
  0x49   :  { %v1078_v3 = vpack.c.bf16 %v343_v60, %v342_v57  ;;  %v345_v5 = vmax.f32 %v281_v62, 0.0  ;;  %1148 = vst [vmem:[%s1505_s3 + $0xe0] sm:$0xff] %v1073_v63   ;;  %v283_v6 = vadd.f32 %v1192_v7, %v212_v0 }
  0x4a   :  { %v346_v8 = vmax.f32 %v282_v2, 0.0 }
  0x4b   :  { %1149 = vst [vmem:[%s1505_s3 + $0xe8] sm:$0xff] %v1078_v3   ;;  %v1083_v9 = vpack.c.bf16 %v345_v5, %v344_v4  ;;  %v347_v10 = vmax.f32 %v283_v6, 0.0 }
  0x4d   :  { %1150 = vst [vmem:[%s1505_s3 + $0xf0] sm:$0xff] %v1083_v9   ;;  %v1088_v1 = vpack.c.bf16 %v347_v10, %v346_v8 }
  0x4f   :  { %1151 = vst [vmem:[%s1505_s3 + $0xf8] sm:$0xff] %v1088_v1  }

// kernel: basic_block_forward.14
= control target key start
LH: loop header
LB: loop body
LE: loop exit
PB: predicated region body
PF: predicated region fallthrough
CT: control target
= control target key end

     0   :  { %s1438_s0 = inlined_call_operand.vmem [shape: bf16[512,128], index: 0, kind: input, shape index: {}]   ;;  %s1439_s1 = inlined_call_operand.vmem [shape: f32[1,128], index: 1, kind: input, shape index: {}]   ;;  %s1440_s2 = inlined_call_operand.vmem [shape: f32[1,128], index: 2, kind: input, shape index: {}]   ;;  %s1441_s3 = inlined_call_operand.vmem [shape: bf16[512,128], index: 3, kind: output, shape index: {}]  }
   0x1   :  { %v739_v0 = vld [vmem:[%s1438_s0] sm:$0xff]   ;;  %v1026_v4 = vld [vmem:[%s1438_s0 + $0x8] sm:$0xff]   ;;  %v1027_v5 = vld [vmem:[%s1438_s0 + $0x10] sm:$0xff]  }
   0x2   :  { %v1114_v1 = vld [vmem:[%s1439_s1] ss:$0 sm:$0xff]  ;;  %v740_v2 = vunpack.c.l.bf16 %v739_v0  ;;  %v741_v3 = vunpack.c.h.bf16 %v739_v0  ;;  %v1028_v6 = vld [vmem:[%s1438_s0 + $0x18] sm:$0xff]   ;;  %v744_v8 = vunpack.c.l.bf16 %v1026_v4  ;;  %v745_v9 = vunpack.c.h.bf16 %v1026_v4  ;;  %v1030_v25 = vld [vmem:[%s1438_s0 + $0x28] sm:$0xff]  }
   0x3   :  { %v1128_v7 = vld [vmem:[%s1440_s2] ss:$0 sm:$0xff]  ;;  %v748_v10 = vunpack.c.l.bf16 %v1027_v5  ;;  %v749_v11 = vunpack.c.h.bf16 %v1027_v5  ;;  %v752_v14 = vunpack.c.l.bf16 %v1028_v6  ;;  %v753_v15 = vunpack.c.h.bf16 %v1028_v6  ;;  %v1031_v30 = vld [vmem:[%s1438_s0 + $0x30] sm:$0xff]   ;;  %v1032_v35 = vld [vmem:[%s1438_s0 + $0x38] sm:$0xff]  }
   0x4   :  { %v149_v12 = vmul.f32 %v740_v2, %v1114_v1  ;;  %v150_v13 = vmul.f32 %v741_v3, %v1114_v1  ;;  %v151_v16 = vmul.f32 %v744_v8, %v1114_v1  ;;  %v152_v17 = vmul.f32 %v745_v9, %v1114_v1  ;;  %v1029_v20 = vld [vmem:[%s1438_s0 + $0x20] sm:$0xff]   ;;  %v1034_v57 = vld [vmem:[%s1438_s0 + $0x48] sm:$0xff]   ;;  %v1035_v62 = vld [vmem:[%s1438_s0 + $0x50] sm:$0xff]  }
   0x5   :  { %v153_v18 = vmul.f32 %v748_v10, %v1114_v1  ;;  %v154_v19 = vmul.f32 %v749_v11, %v1114_v1  ;;  %v155_v23 = vmul.f32 %v752_v14, %v1114_v1  ;;  %v156_v24 = vmul.f32 %v753_v15, %v1114_v1  ;;  %v1033_v48 = vld [vmem:[%s1438_s0 + $0x40] sm:$0xff]   ;;  %v1036_v9 = vld [vmem:[%s1438_s0 + $0x58] sm:$0xff]  }
   0x6   :  { %v220_v21 = vadd.f32 %v1128_v7, %v149_v12  ;;  %v221_v22 = vadd.f32 %v1128_v7, %v150_v13  ;;  %v222_v26 = vadd.f32 %v1128_v7, %v151_v16  ;;  %v223_v27 = vadd.f32 %v1128_v7, %v152_v17  ;;  %v1037_v14 = vld [vmem:[%s1438_s0 + $0x60] sm:$0xff]  }
   0x7   :  { %v224_v28 = vadd.f32 %v1128_v7, %v153_v18  ;;  %v225_v29 = vadd.f32 %v1128_v7, %v154_v19  ;;  %v226_v32 = vadd.f32 %v1128_v7, %v155_v23  ;;  %v227_v33 = vadd.f32 %v1128_v7, %v156_v24 }
   0x8   :  { %v869_v31 = vpack.c.bf16 %v221_v22, %v220_v21  ;;  %v756_v34 = vunpack.c.l.bf16 %v1029_v20  ;;  %v874_v36 = vpack.c.bf16 %v223_v27, %v222_v26  ;;  %v757_v38 = vunpack.c.h.bf16 %v1029_v20  ;;  %v1038_v27 = vld [vmem:[%s1438_s0 + $0x68] sm:$0xff]  }
   0x9   :  { %v879_v37 = vpack.c.bf16 %v225_v29, %v224_v28  ;;  %v760_v39 = vunpack.c.l.bf16 %v1030_v25  ;;  %v884_v40 = vpack.c.bf16 %v227_v33, %v226_v32  ;;  %v761_v42 = vunpack.c.h.bf16 %v1030_v25 }
   0xa   :  { %870 = vst [vmem:[%s1441_s3] sm:$0xff] %v869_v31   ;;  %v157_v41 = vmul.f32 %v756_v34, %v1114_v1  ;;  %v764_v43 = vunpack.c.l.bf16 %v1031_v30  ;;  %1057 = vst [vmem:[%s1441_s3 + $0x8] sm:$0xff] %v874_v36   ;;  %v158_v44 = vmul.f32 %v757_v38, %v1114_v1  ;;  %v765_v46 = vunpack.c.h.bf16 %v1031_v30  ;;  %v1039_v36 = vld [vmem:[%s1438_s0 + $0x70] sm:$0xff]  }
   0xb   :  { %1058 = vst [vmem:[%s1441_s3 + $0x10] sm:$0xff] %v879_v37   ;;  %v159_v45 = vmul.f32 %v760_v39, %v1114_v1  ;;  %v768_v47 = vunpack.c.l.bf16 %v1032_v35  ;;  %1059 = vst [vmem:[%s1441_s3 + $0x18] sm:$0xff] %v884_v40   ;;  %v160_v50 = vmul.f32 %v761_v42, %v1114_v1  ;;  %v769_v52 = vunpack.c.h.bf16 %v1032_v35 }
   0xc   :  { %v228_v49 = vadd.f32 %v1128_v7, %v157_v41  ;;  %v161_v51 = vmul.f32 %v764_v43, %v1114_v1  ;;  %v229_v53 = vadd.f32 %v1128_v7, %v158_v44  ;;  %v162_v55 = vmul.f32 %v765_v46, %v1114_v1  ;;  %v1040_v41 = vld [vmem:[%s1438_s0 + $0x78] sm:$0xff]  }
   0xd   :  { %v230_v54 = vadd.f32 %v1128_v7, %v159_v45  ;;  %v163_v56 = vmul.f32 %v768_v47, %v1114_v1  ;;  %v231_v58 = vadd.f32 %v1128_v7, %v160_v50  ;;  %v164_v60 = vmul.f32 %v769_v52, %v1114_v1  ;;  %v1041_v50 = vld [vmem:[%s1438_s0 + $0x80] sm:$0xff]  }
   0xe   :  { %v232_v59 = vadd.f32 %v1128_v7, %v161_v51  ;;  %v772_v61 = vunpack.c.l.bf16 %v1033_v48  ;;  %v889_v63 = vpack.c.bf16 %v229_v53, %v228_v49  ;;  %v233_v0 = vadd.f32 %v1128_v7, %v162_v55 }
   0xf   :  { %v234_v2 = vadd.f32 %v1128_v7, %v163_v56  ;;  %v773_v3 = vunpack.c.h.bf16 %v1033_v48  ;;  %v894_v4 = vpack.c.bf16 %v231_v58, %v230_v54  ;;  %v235_v5 = vadd.f32 %v1128_v7, %v164_v60 }
  0x10   :  { %v165_v6 = vmul.f32 %v772_v61, %v1114_v1  ;;  %v776_v8 = vunpack.c.l.bf16 %v1034_v57  ;;  %1060 = vst [vmem:[%s1441_s3 + $0x20] sm:$0xff] %v889_v63   ;;  %v899_v10 = vpack.c.bf16 %v233_v0, %v232_v59  ;;  %v777_v12 = vunpack.c.h.bf16 %v1034_v57  ;;  %v1042_v59 = vld [vmem:[%s1438_s0 + $0x88] sm:$0xff]   ;;  %v1043_v0 = vld [vmem:[%s1438_s0 + $0x90] sm:$0xff]  }
  0x11   :  { %v166_v11 = vmul.f32 %v773_v3, %v1114_v1  ;;  %v780_v13 = vunpack.c.l.bf16 %v1035_v62  ;;  %1061 = vst [vmem:[%s1441_s3 + $0x28] sm:$0xff] %v894_v4   ;;  %v904_v15 = vpack.c.bf16 %v235_v5, %v234_v2  ;;  %v781_v18 = vunpack.c.h.bf16 %v1035_v62 }
  0x12   :  { %v236_v16 = vadd.f32 %v1128_v7, %v165_v6  ;;  %v167_v17 = vmul.f32 %v776_v8, %v1114_v1  ;;  %1062 = vst [vmem:[%s1441_s3 + $0x30] sm:$0xff] %v899_v10   ;;  %v168_v20 = vmul.f32 %v777_v12, %v1114_v1  ;;  %v784_v22 = vunpack.c.l.bf16 %v1036_v9 }
  0x13   :  { %v237_v19 = vadd.f32 %v1128_v7, %v166_v11  ;;  %v169_v21 = vmul.f32 %v780_v13, %v1114_v1  ;;  %1063 = vst [vmem:[%s1441_s3 + $0x38] sm:$0xff] %v904_v15   ;;  %v170_v24 = vmul.f32 %v781_v18, %v1114_v1  ;;  %v785_v25 = vunpack.c.h.bf16 %v1036_v9  ;;  %v1044_v11 = vld [vmem:[%s1438_s0 + $0x98] sm:$0xff]  }
  0x14   :  { %v238_v23 = vadd.f32 %v1128_v7, %v167_v17  ;;  %v788_v26 = vunpack.c.l.bf16 %v1037_v14  ;;  %v239_v29 = vadd.f32 %v1128_v7, %v168_v20  ;;  %v171_v31 = vmul.f32 %v784_v22, %v1114_v1 }
  0x15   :  { %v909_v28 = vpack.c.bf16 %v237_v19, %v236_v16  ;;  %v240_v30 = vadd.f32 %v1128_v7, %v169_v21  ;;  %v241_v32 = vadd.f32 %v1128_v7, %v170_v24  ;;  %v172_v33 = vmul.f32 %v785_v25, %v1114_v1  ;;  %v1045_v16 = vld [vmem:[%s1438_s0 + $0xa0] sm:$0xff]  }
  0x16   :  { %v789_v34 = vunpack.c.h.bf16 %v1037_v14  ;;  %v173_v35 = vmul.f32 %v788_v26, %v1114_v1  ;;  %v914_v37 = vpack.c.bf16 %v239_v29, %v238_v23  ;;  %v242_v38 = vadd.f32 %v1128_v7, %v171_v31  ;;  %v1046_v29 = vld [vmem:[%s1438_s0 + $0xa8] sm:$0xff]  }
  0x17   :  { %1064 = vst [vmem:[%s1441_s3 + $0x40] sm:$0xff] %v909_v28   ;;  %v792_v39 = vunpack.c.l.bf16 %v1038_v27  ;;  %v793_v40 = vunpack.c.h.bf16 %v1038_v27  ;;  %v919_v42 = vpack.c.bf16 %v241_v32, %v240_v30  ;;  %v243_v43 = vadd.f32 %v1128_v7, %v172_v33 }
  0x18   :  { %v174_v44 = vmul.f32 %v789_v34, %v1114_v1  ;;  %v244_v45 = vadd.f32 %v1128_v7, %v173_v35  ;;  %1065 = vst [vmem:[%s1441_s3 + $0x48] sm:$0xff] %v914_v37   ;;  %v796_v48 = vunpack.c.l.bf16 %v1039_v36  ;;  %v797_v49 = vunpack.c.h.bf16 %v1039_v36 }
  0x19   :  { %v175_v46 = vmul.f32 %v792_v39, %v1114_v1  ;;  %v176_v47 = vmul.f32 %v793_v40, %v1114_v1  ;;  %1066 = vst [vmem:[%s1441_s3 + $0x50] sm:$0xff] %v919_v42   ;;  %v924_v51 = vpack.c.bf16 %v243_v43, %v242_v38  ;;  %v800_v53 = vunpack.c.l.bf16 %v1040_v41  ;;  %v1047_v38 = vld [vmem:[%s1438_s0 + $0xb0] sm:$0xff]   ;;  %v1048_v43 = vld [vmem:[%s1438_s0 + $0xb8] sm:$0xff]  }
  0x1a   :  { %v245_v52 = vadd.f32 %v1128_v7, %v174_v44  ;;  %v801_v54 = vunpack.c.h.bf16 %v1040_v41  ;;  %v177_v57 = vmul.f32 %v796_v48, %v1114_v1  ;;  %v178_v58 = vmul.f32 %v797_v49, %v1114_v1 }
  0x1b   :  { %v246_v55 = vadd.f32 %v1128_v7, %v175_v46  ;;  %v247_v56 = vadd.f32 %v1128_v7, %v176_v47  ;;  %1067 = vst [vmem:[%s1441_s3 + $0x58] sm:$0xff] %v924_v51   ;;  %v179_v61 = vmul.f32 %v800_v53, %v1114_v1  ;;  %v804_v63 = vunpack.c.l.bf16 %v1041_v50 }
  0x1c   :  { %v929_v60 = vpack.c.bf16 %v245_v52, %v244_v45  ;;  %v180_v62 = vmul.f32 %v801_v54, %v1114_v1  ;;  %v248_v3 = vadd.f32 %v1128_v7, %v177_v57  ;;  %v249_v4 = vadd.f32 %v1128_v7, %v178_v58  ;;  %v1049_v52 = vld [vmem:[%s1438_s0 + $0xc0] sm:$0xff]  }
  0x1d   :  { %v934_v2 = vpack.c.bf16 %v247_v56, %v246_v55  ;;  %v805_v5 = vunpack.c.h.bf16 %v1041_v50  ;;  %v250_v6 = vadd.f32 %v1128_v7, %v179_v61  ;;  %v181_v9 = vmul.f32 %v804_v63, %v1114_v1  ;;  %v1050_v61 = vld [vmem:[%s1438_s0 + $0xc8] sm:$0xff]  }
  0x1e   :  { %1068 = vst [vmem:[%s1441_s3 + $0x60] sm:$0xff] %v929_v60   ;;  %v251_v8 = vadd.f32 %v1128_v7, %v180_v62  ;;  %v808_v10 = vunpack.c.l.bf16 %v1042_v59  ;;  %v939_v12 = vpack.c.bf16 %v249_v4, %v248_v3  ;;  %v809_v14 = vunpack.c.h.bf16 %v1042_v59  ;;  %v1051_v3 = vld [vmem:[%s1438_s0 + $0xd0] sm:$0xff]  }
  0x1f   :  { %1069 = vst [vmem:[%s1441_s3 + $0x68] sm:$0xff] %v934_v2   ;;  %v182_v13 = vmul.f32 %v805_v5, %v1114_v1  ;;  %v812_v15 = vunpack.c.l.bf16 %v1043_v0  ;;  %v252_v18 = vadd.f32 %v1128_v7, %v181_v9  ;;  %v813_v20 = vunpack.c.h.bf16 %v1043_v0 }
  0x20   :  { %v944_v17 = vpack.c.bf16 %v251_v8, %v250_v6  ;;  %v183_v19 = vmul.f32 %v808_v10, %v1114_v1  ;;  %1070 = vst [vmem:[%s1441_s3 + $0x70] sm:$0xff] %v939_v12   ;;  %v184_v22 = vmul.f32 %v809_v14, %v1114_v1  ;;  %v816_v24 = vunpack.c.l.bf16 %v1044_v11 }
  0x21   :  { %v253_v21 = vadd.f32 %v1128_v7, %v182_v13  ;;  %v185_v23 = vmul.f32 %v812_v15, %v1114_v1  ;;  %v186_v26 = vmul.f32 %v813_v20, %v1114_v1  ;;  %v817_v27 = vunpack.c.h.bf16 %v1044_v11  ;;  %v1052_v13 = vld [vmem:[%s1438_s0 + $0xd8] sm:$0xff]  }
  0x22   :  { %1071 = vst [vmem:[%s1441_s3 + $0x78] sm:$0xff] %v944_v17   ;;  %v254_v25 = vadd.f32 %v1128_v7, %v183_v19  ;;  %v820_v28 = vunpack.c.l.bf16 %v1045_v16  ;;  %v255_v31 = vadd.f32 %v1128_v7, %v184_v22  ;;  %v187_v33 = vmul.f32 %v816_v24, %v1114_v1 }
  0x23   :  { %v949_v30 = vpack.c.bf16 %v253_v21, %v252_v18  ;;  %v256_v32 = vadd.f32 %v1128_v7, %v185_v23  ;;  %v257_v34 = vadd.f32 %v1128_v7, %v186_v26  ;;  %v188_v35 = vmul.f32 %v817_v27, %v1114_v1  ;;  %v1053_v18 = vld [vmem:[%s1438_s0 + $0xe0] sm:$0xff]  }
  0x24   :  { %v821_v36 = vunpack.c.h.bf16 %v1045_v16  ;;  %v189_v37 = vmul.f32 %v820_v28, %v1114_v1  ;;  %v954_v39 = vpack.c.bf16 %v255_v31, %v254_v25  ;;  %v258_v40 = vadd.f32 %v1128_v7, %v187_v33  ;;  %v1054_v31 = vld [vmem:[%s1438_s0 + $0xe8] sm:$0xff]  }
  0x25   :  { %1072 = vst [vmem:[%s1441_s3 + $0x80] sm:$0xff] %v949_v30   ;;  %v824_v41 = vunpack.c.l.bf16 %v1046_v29  ;;  %v825_v42 = vunpack.c.h.bf16 %v1046_v29  ;;  %v959_v44 = vpack.c.bf16 %v257_v34, %v256_v32  ;;  %v259_v45 = vadd.f32 %v1128_v7, %v188_v35 }
  0x26   :  { %v190_v46 = vmul.f32 %v821_v36, %v1114_v1  ;;  %v260_v47 = vadd.f32 %v1128_v7, %v189_v37  ;;  %1073 = vst [vmem:[%s1441_s3 + $0x88] sm:$0xff] %v954_v39   ;;  %v828_v50 = vunpack.c.l.bf16 %v1047_v38  ;;  %v829_v51 = vunpack.c.h.bf16 %v1047_v38 }
  0x27   :  { %v191_v48 = vmul.f32 %v824_v41, %v1114_v1  ;;  %v192_v49 = vmul.f32 %v825_v42, %v1114_v1  ;;  %1074 = vst [vmem:[%s1441_s3 + $0x90] sm:$0xff] %v959_v44   ;;  %v964_v53 = vpack.c.bf16 %v259_v45, %v258_v40  ;;  %v832_v55 = vunpack.c.l.bf16 %v1048_v43  ;;  %v1055_v40 = vld [vmem:[%s1438_s0 + $0xf0] sm:$0xff]   ;;  %v1056_v45 = vld [vmem:[%s1438_s0 + $0xf8] sm:$0xff]  }
  0x28   :  { %v261_v54 = vadd.f32 %v1128_v7, %v190_v46  ;;  %v833_v56 = vunpack.c.h.bf16 %v1048_v43  ;;  %v193_v59 = vmul.f32 %v828_v50, %v1114_v1  ;;  %v194_v60 = vmul.f32 %v829_v51, %v1114_v1 }
  0x29   :  { %v262_v57 = vadd.f32 %v1128_v7, %v191_v48  ;;  %v263_v58 = vadd.f32 %v1128_v7, %v192_v49  ;;  %1075 = vst [vmem:[%s1441_s3 + $0x98] sm:$0xff] %v964_v53   ;;  %v195_v63 = vmul.f32 %v832_v55, %v1114_v1  ;;  %v836_v2 = vunpack.c.l.bf16 %v1049_v52 }
  0x2a   :  { %v969_v62 = vpack.c.bf16 %v261_v54, %v260_v47  ;;  %v196_v0 = vmul.f32 %v833_v56, %v1114_v1  ;;  %v264_v5 = vadd.f32 %v1128_v7, %v193_v59  ;;  %v265_v6 = vadd.f32 %v1128_v7, %v194_v60 }
  0x2b   :  { %v974_v4 = vpack.c.bf16 %v263_v58, %v262_v57  ;;  %v837_v8 = vunpack.c.h.bf16 %v1049_v52  ;;  %v266_v9 = vadd.f32 %v1128_v7, %v195_v63  ;;  %v197_v11 = vmul.f32 %v836_v2, %v1114_v1 }
  0x2c   :  { %1076 = vst [vmem:[%s1441_s3 + $0xa0] sm:$0xff] %v969_v62   ;;  %v267_v10 = vadd.f32 %v1128_v7, %v196_v0  ;;  %v840_v12 = vunpack.c.l.bf16 %v1050_v61  ;;  %v979_v14 = vpack.c.bf16 %v265_v6, %v264_v5  ;;  %v841_v16 = vunpack.c.h.bf16 %v1050_v61 }
  0x2d   :  { %1077 = vst [vmem:[%s1441_s3 + $0xa8] sm:$0xff] %v974_v4   ;;  %v198_v15 = vmul.f32 %v837_v8, %v1114_v1  ;;  %v844_v17 = vunpack.c.l.bf16 %v1051_v3  ;;  %v268_v20 = vadd.f32 %v1128_v7, %v197_v11  ;;  %v845_v22 = vunpack.c.h.bf16 %v1051_v3 }
  0x2e   :  { %v984_v19 = vpack.c.bf16 %v267_v10, %v266_v9  ;;  %v199_v21 = vmul.f32 %v840_v12, %v1114_v1  ;;  %1078 = vst [vmem:[%s1441_s3 + $0xb0] sm:$0xff] %v979_v14   ;;  %v200_v24 = vmul.f32 %v841_v16, %v1114_v1  ;;  %v848_v26 = vunpack.c.l.bf16 %v1052_v13 }
  0x2f   :  { %v269_v23 = vadd.f32 %v1128_v7, %v198_v15  ;;  %v201_v25 = vmul.f32 %v844_v17, %v1114_v1  ;;  %v202_v28 = vmul.f32 %v845_v22, %v1114_v1  ;;  %v849_v29 = vunpack.c.h.bf16 %v1052_v13 }
  0x30   :  { %1079 = vst [vmem:[%s1441_s3 + $0xb8] sm:$0xff] %v984_v19   ;;  %v270_v27 = vadd.f32 %v1128_v7, %v199_v21  ;;  %v852_v30 = vunpack.c.l.bf16 %v1053_v18  ;;  %v271_v33 = vadd.f32 %v1128_v7, %v200_v24  ;;  %v203_v35 = vmul.f32 %v848_v26, %v1114_v1 }
  0x31   :  { %v989_v32 = vpack.c.bf16 %v269_v23, %v268_v20  ;;  %v272_v34 = vadd.f32 %v1128_v7, %v201_v25  ;;  %v273_v36 = vadd.f32 %v1128_v7, %v202_v28  ;;  %v204_v37 = vmul.f32 %v849_v29, %v1114_v1 }
  0x32   :  { %v853_v38 = vunpack.c.h.bf16 %v1053_v18  ;;  %v205_v39 = vmul.f32 %v852_v30, %v1114_v1  ;;  %v994_v41 = vpack.c.bf16 %v271_v33, %v270_v27  ;;  %v274_v42 = vadd.f32 %v1128_v7, %v203_v35 }
  0x33   :  { %1080 = vst [vmem:[%s1441_s3 + $0xc0] sm:$0xff] %v989_v32   ;;  %v856_v43 = vunpack.c.l.bf16 %v1054_v31  ;;  %v857_v44 = vunpack.c.h.bf16 %v1054_v31  ;;  %v999_v46 = vpack.c.bf16 %v273_v36, %v272_v34  ;;  %v275_v47 = vadd.f32 %v1128_v7, %v204_v37 }
  0x34   :  { %v206_v48 = vmul.f32 %v853_v38, %v1114_v1  ;;  %v276_v49 = vadd.f32 %v1128_v7, %v205_v39  ;;  %1081 = vst [vmem:[%s1441_s3 + $0xc8] sm:$0xff] %v994_v41   ;;  %v860_v52 = vunpack.c.l.bf16 %v1055_v40  ;;  %v861_v53 = vunpack.c.h.bf16 %v1055_v40 }
  0x35   :  { %v207_v50 = vmul.f32 %v856_v43, %v1114_v1  ;;  %v208_v51 = vmul.f32 %v857_v44, %v1114_v1  ;;  %1082 = vst [vmem:[%s1441_s3 + $0xd0] sm:$0xff] %v999_v46   ;;  %v1004_v54 = vpack.c.bf16 %v275_v47, %v274_v42  ;;  %v864_v56 = vunpack.c.l.bf16 %v1056_v45 }
  0x36   :  { %v277_v55 = vadd.f32 %v1128_v7, %v206_v48  ;;  %v865_v57 = vunpack.c.h.bf16 %v1056_v45  ;;  %v209_v60 = vmul.f32 %v860_v52, %v1114_v1  ;;  %v210_v61 = vmul.f32 %v861_v53, %v1114_v1 }
  0x37   :  { %v278_v58 = vadd.f32 %v1128_v7, %v207_v50  ;;  %v279_v59 = vadd.f32 %v1128_v7, %v208_v51  ;;  %1083 = vst [vmem:[%s1441_s3 + $0xd8] sm:$0xff] %v1004_v54   ;;  %v211_v63 = vmul.f32 %v864_v56, %v1114_v1 }
  0x38   :  { %v1009_v62 = vpack.c.bf16 %v277_v55, %v276_v49  ;;  %v212_v0 = vmul.f32 %v865_v57, %v1114_v1  ;;  %v280_v3 = vadd.f32 %v1128_v7, %v209_v60  ;;  %v281_v4 = vadd.f32 %v1128_v7, %v210_v61 }
  0x39   :  { %v1014_v2 = vpack.c.bf16 %v279_v59, %v278_v58  ;;  %v282_v5 = vadd.f32 %v1128_v7, %v211_v63 }
  0x3a   :  { %1084 = vst [vmem:[%s1441_s3 + $0xe0] sm:$0xff] %v1009_v62   ;;  %v283_v6 = vadd.f32 %v1128_v7, %v212_v0  ;;  %v1019_v8 = vpack.c.bf16 %v281_v4, %v280_v3 }
  0x3b   :  { %1085 = vst [vmem:[%s1441_s3 + $0xe8] sm:$0xff] %v1014_v2  }
  0x3c   :  { %v1024_v9 = vpack.c.bf16 %v283_v6, %v282_v5  ;;  %1086 = vst [vmem:[%s1441_s3 + $0xf0] sm:$0xff] %v1019_v8  }
  0x3e   :  { %1087 = vst [vmem:[%s1441_s3 + $0xf8] sm:$0xff] %v1024_v9  }

// kernel: basic_block_forward.17
= control target key start
LH: loop header
LB: loop body
LE: loop exit
PB: predicated region body
PF: predicated region fallthrough
CT: control target
= control target key end

     0   :  { %s1478_s0 = inlined_call_operand.vmem [shape: bf16[512,128], index: 0, kind: input, shape index: {}]   ;;  %s1479_s1 = inlined_call_operand.vmem [shape: f32[1,128], index: 1, kind: input, shape index: {}]   ;;  %s1480_s2 = inlined_call_operand.vmem [shape: f32[1,128], index: 2, kind: input, shape index: {}]   ;;  %s1481_s3 = inlined_call_operand.vmem [shape: bf16[512,128], index: 3, kind: input, shape index: {}]   ;;  %s1482_s4 = inlined_call_operand.vmem [shape: f32[512,128], index: 4, kind: output, shape index: {}]  }
   0x1   :  { %v614_v0 = vld [vmem:[%s1478_s0] sm:$0xff]   ;;  %v869_v5 = vld [vmem:[%s1478_s0 + $0x8] sm:$0xff]   ;;  %v870_v12 = vld [vmem:[%s1478_s0 + $0x10] sm:$0xff]  }
   0x2   :  { %v962_v1 = vld [vmem:[%s1479_s1] ss:$0 sm:$0xff]  ;;  %v615_v2 = vunpack.c.l.bf16 %v614_v0  ;;  %v616_v4 = vunpack.c.h.bf16 %v614_v0  ;;  %v900_v6 = vld [vmem:[%s1481_s3 + $0x8] sm:$0xff]   ;;  %v619_v10 = vunpack.c.l.bf16 %v869_v5  ;;  %v901_v13 = vld [vmem:[%s1481_s3 + $0x10] sm:$0xff]   ;;  %v620_v16 = vunpack.c.h.bf16 %v869_v5 }
   0x3   :  { %v742_v3 = vld [vmem:[%s1481_s3] sm:$0xff]   ;;  %v747_v11 = vunpack.c.l.bf16 %v900_v6  ;;  %v748_v17 = vunpack.c.h.bf16 %v900_v6  ;;  %v871_v18 = vld [vmem:[%s1478_s0 + $0x18] sm:$0xff]   ;;  %v623_v20 = vunpack.c.l.bf16 %v870_v12  ;;  %v751_v21 = vunpack.c.l.bf16 %v901_v13  ;;  %v873_v54 = vld [vmem:[%s1478_s0 + $0x28] sm:$0xff]  }
   0x4   :  { %v976_v7 = vld [vmem:[%s1480_s2] ss:$0 sm:$0xff]  ;;  %v743_v8 = vunpack.c.l.bf16 %v742_v3  ;;  %v744_v9 = vunpack.c.h.bf16 %v742_v3  ;;  %v152_v14 = vmul.f32 %v615_v2, %v962_v1  ;;  %v153_v15 = vmul.f32 %v616_v4, %v962_v1  ;;  %v902_v23 = vld [vmem:[%s1481_s3 + $0x18] sm:$0xff]   ;;  %v904_v55 = vld [vmem:[%s1481_s3 + $0x28] sm:$0xff]  }
   0x5   :  { %v154_v19 = vmul.f32 %v619_v10, %v962_v1  ;;  %v624_v22 = vunpack.c.h.bf16 %v870_v12  ;;  %v155_v26 = vmul.f32 %v620_v16, %v962_v1  ;;  %v752_v27 = vunpack.c.h.bf16 %v901_v13  ;;  %v872_v40 = vld [vmem:[%s1478_s0 + $0x20] sm:$0xff]   ;;  %v874_v0 = vld [vmem:[%s1478_s0 + $0x30] sm:$0xff]   ;;  %v875_v16 = vld [vmem:[%s1478_s0 + $0x38] sm:$0xff]  }
   0x6   :  { %v223_v24 = vadd.f32 %v976_v7, %v152_v14  ;;  %v224_v25 = vadd.f32 %v976_v7, %v153_v15  ;;  %v156_v29 = vmul.f32 %v623_v20, %v962_v1  ;;  %v627_v31 = vunpack.c.l.bf16 %v871_v18  ;;  %v903_v45 = vld [vmem:[%s1481_s3 + $0x20] sm:$0xff]   ;;  %v905_v2 = vld [vmem:[%s1481_s3 + $0x30] sm:$0xff]  }
   0x7   :  { %v225_v28 = vadd.f32 %v976_v7, %v154_v19  ;;  %v157_v30 = vmul.f32 %v624_v22, %v962_v1  ;;  %v226_v34 = vadd.f32 %v976_v7, %v155_v26  ;;  %v755_v35 = vunpack.c.l.bf16 %v902_v23 }
   0x8   :  { %v415_v32 = vadd.f32 %v743_v8, %v223_v24  ;;  %v416_v33 = vadd.f32 %v744_v9, %v224_v25  ;;  %v227_v37 = vadd.f32 %v976_v7, %v156_v29  ;;  %v158_v39 = vmul.f32 %v627_v31, %v962_v1 }
   0x9   :  { %v417_v36 = vadd.f32 %v747_v11, %v225_v28  ;;  %v228_v38 = vadd.f32 %v976_v7, %v157_v30  ;;  %v418_v43 = vadd.f32 %v748_v17, %v226_v34  ;;  %v628_v44 = vunpack.c.h.bf16 %v871_v18  ;;  %v876_v34 = vld [vmem:[%s1478_s0 + $0x40] sm:$0xff]  }
   0xa   :  { %v479_v41 = vmax.f32 %v415_v32, 0.0  ;;  %v480_v42 = vmax.f32 %v416_v33, 0.0  ;;  %v419_v47 = vadd.f32 %v751_v21, %v227_v37  ;;  %v229_v49 = vadd.f32 %v976_v7, %v158_v39  ;;  %v906_v21 = vld [vmem:[%s1481_s3 + $0x38] sm:$0xff]   ;;  %v907_v39 = vld [vmem:[%s1481_s3 + $0x40] sm:$0xff]  }
   0xb   :  { %v481_v46 = vmax.f32 %v417_v36, 0.0  ;;  %v420_v48 = vadd.f32 %v752_v27, %v228_v38  ;;  %v482_v50 = vmax.f32 %v418_v43, 0.0  ;;  %v159_v51 = vmul.f32 %v628_v44, %v962_v1 }
   0xc   :  { %543 = vst [vmem:[%s1482_s4] sm:$0xff] %v479_v41  ;;  %544 = vst [vmem:[%s1482_s4 + $0x8] sm:$0xff] %v480_v42  ;;  %v756_v52 = vunpack.c.h.bf16 %v902_v23  ;;  %v631_v53 = vunpack.c.l.bf16 %v872_v40  ;;  %v483_v56 = vmax.f32 %v419_v47, 0.0  ;;  %v421_v58 = vadd.f32 %v755_v35, %v229_v49  ;;  %v908_v49 = vld [vmem:[%s1481_s3 + $0x48] sm:$0xff]  }
   0xd   :  { %545 = vst [vmem:[%s1482_s4 + $0x10] sm:$0xff] %v481_v46  ;;  %v484_v57 = vmax.f32 %v420_v48, 0.0  ;;  %v759_v59 = vunpack.c.l.bf16 %v903_v45  ;;  %546 = vst [vmem:[%s1482_s4 + $0x18] sm:$0xff] %v482_v50  ;;  %v230_v60 = vadd.f32 %v976_v7, %v159_v51  ;;  %v632_v62 = vunpack.c.h.bf16 %v872_v40  ;;  %v877_v48 = vld [vmem:[%s1478_s0 + $0x48] sm:$0xff]  }
   0xe   :  { %v160_v61 = vmul.f32 %v631_v53, %v962_v1  ;;  %v760_v63 = vunpack.c.h.bf16 %v903_v45  ;;  %547 = vst [vmem:[%s1482_s4 + $0x20] sm:$0xff] %v483_v56  ;;  %v485_v3 = vmax.f32 %v421_v58, 0.0  ;;  %v635_v4 = vunpack.c.l.bf16 %v873_v54  ;;  %v878_v58 = vld [vmem:[%s1478_s0 + $0x50] sm:$0xff]  }
   0xf   :  { %548 = vst [vmem:[%s1482_s4 + $0x28] sm:$0xff] %v484_v57  ;;  %v763_v5 = vunpack.c.l.bf16 %v904_v55  ;;  %v636_v6 = vunpack.c.h.bf16 %v873_v54  ;;  %v422_v8 = vadd.f32 %v756_v52, %v230_v60  ;;  %v161_v10 = vmul.f32 %v632_v62, %v962_v1 }
  0x10   :  { %v231_v9 = vadd.f32 %v976_v7, %v160_v61  ;;  %v764_v11 = vunpack.c.h.bf16 %v904_v55  ;;  %549 = vst [vmem:[%s1482_s4 + $0x30] sm:$0xff] %v485_v3  ;;  %v162_v12 = vmul.f32 %v635_v4, %v962_v1  ;;  %v639_v14 = vunpack.c.l.bf16 %v874_v0 }
  0x11   :  { %v163_v13 = vmul.f32 %v636_v6, %v962_v1  ;;  %v767_v15 = vunpack.c.l.bf16 %v905_v2  ;;  %v486_v17 = vmax.f32 %v422_v8, 0.0  ;;  %v232_v19 = vadd.f32 %v976_v7, %v161_v10  ;;  %v879_v10 = vld [vmem:[%s1478_s0 + $0x58] sm:$0xff]  }
  0x12   :  { %v423_v18 = vadd.f32 %v759_v59, %v231_v9  ;;  %v640_v20 = vunpack.c.h.bf16 %v874_v0  ;;  %v233_v22 = vadd.f32 %v976_v7, %v162_v12  ;;  %v164_v24 = vmul.f32 %v639_v14, %v962_v1 }
  0x13   :  { %v234_v23 = vadd.f32 %v976_v7, %v163_v13  ;;  %v768_v25 = vunpack.c.h.bf16 %v905_v2  ;;  %550 = vst [vmem:[%s1482_s4 + $0x38] sm:$0xff] %v486_v17  ;;  %v424_v27 = vadd.f32 %v760_v63, %v232_v19  ;;  %v643_v29 = vunpack.c.l.bf16 %v875_v16  ;;  %v909_v63 = vld [vmem:[%s1481_s3 + $0x50] sm:$0xff]   ;;  %v910_v19 = vld [vmem:[%s1481_s3 + $0x58] sm:$0xff]  }
  0x14   :  { %v487_v26 = vmax.f32 %v423_v18, 0.0  ;;  %v165_v28 = vmul.f32 %v640_v20, %v962_v1  ;;  %v425_v30 = vadd.f32 %v763_v5, %v233_v22  ;;  %v235_v32 = vadd.f32 %v976_v7, %v164_v24 }
  0x15   :  { %v426_v31 = vadd.f32 %v764_v11, %v234_v23  ;;  %v771_v33 = vunpack.c.l.bf16 %v906_v21  ;;  %v488_v35 = vmax.f32 %v424_v27, 0.0  ;;  %v166_v37 = vmul.f32 %v643_v29, %v962_v1 }
  0x16   :  { %551 = vst [vmem:[%s1482_s4 + $0x40] sm:$0xff] %v487_v26  ;;  %v236_v36 = vadd.f32 %v976_v7, %v165_v28  ;;  %v644_v38 = vunpack.c.h.bf16 %v875_v16  ;;  %v489_v40 = vmax.f32 %v425_v30, 0.0  ;;  %v427_v42 = vadd.f32 %v767_v15, %v235_v32  ;;  %v880_v28 = vld [vmem:[%s1478_s0 + $0x60] sm:$0xff]  }
  0x17   :  { %v490_v41 = vmax.f32 %v426_v31, 0.0  ;;  %v772_v43 = vunpack.c.h.bf16 %v906_v21  ;;  %552 = vst [vmem:[%s1482_s4 + $0x48] sm:$0xff] %v488_v35  ;;  %v237_v45 = vadd.f32 %v976_v7, %v166_v37  ;;  %v647_v47 = vunpack.c.l.bf16 %v876_v34 }
  0x18   :  { %v428_v44 = vadd.f32 %v768_v25, %v236_v36  ;;  %v167_v46 = vmul.f32 %v644_v38, %v962_v1  ;;  %553 = vst [vmem:[%s1482_s4 + $0x50] sm:$0xff] %v489_v40  ;;  %v491_v50 = vmax.f32 %v427_v42, 0.0  ;;  %v775_v51 = vunpack.c.l.bf16 %v907_v39  ;;  %v881_v42 = vld [vmem:[%s1478_s0 + $0x68] sm:$0xff]  }
  0x19   :  { %554 = vst [vmem:[%s1482_s4 + $0x58] sm:$0xff] %v490_v41  ;;  %v648_v52 = vunpack.c.h.bf16 %v876_v34  ;;  %v776_v53 = vunpack.c.h.bf16 %v907_v39  ;;  %v429_v55 = vadd.f32 %v771_v33, %v237_v45  ;;  %v168_v57 = vmul.f32 %v647_v47, %v962_v1  ;;  %v911_v33 = vld [vmem:[%s1481_s3 + $0x60] sm:$0xff]  }
  0x1a   :  { %v492_v54 = vmax.f32 %v428_v44, 0.0  ;;  %v238_v56 = vadd.f32 %v976_v7, %v167_v46  ;;  %555 = vst [vmem:[%s1482_s4 + $0x60] sm:$0xff] %v491_v50  ;;  %v651_v60 = vunpack.c.l.bf16 %v877_v48  ;;  %v779_v61 = vunpack.c.l.bf16 %v908_v49 }
  0x1b   :  { %v169_v59 = vmul.f32 %v648_v52, %v962_v1  ;;  %v652_v62 = vunpack.c.h.bf16 %v877_v48  ;;  %v493_v0 = vmax.f32 %v429_v55, 0.0  ;;  %v239_v3 = vadd.f32 %v976_v7, %v168_v57  ;;  %v882_v52 = vld [vmem:[%s1478_s0 + $0x70] sm:$0xff]  }
  0x1c   :  { %556 = vst [vmem:[%s1482_s4 + $0x68] sm:$0xff] %v492_v54  ;;  %v430_v2 = vadd.f32 %v772_v43, %v238_v56  ;;  %v780_v4 = vunpack.c.h.bf16 %v908_v49  ;;  %v170_v6 = vmul.f32 %v651_v60, %v962_v1  ;;  %v655_v9 = vunpack.c.l.bf16 %v878_v58  ;;  %v912_v43 = vld [vmem:[%s1481_s3 + $0x68] sm:$0xff]   ;;  %v913_v57 = vld [vmem:[%s1481_s3 + $0x70] sm:$0xff]  }
  0x1d   :  { %v240_v5 = vadd.f32 %v976_v7, %v169_v59  ;;  %v171_v8 = vmul.f32 %v652_v62, %v962_v1  ;;  %557 = vst [vmem:[%s1482_s4 + $0x70] sm:$0xff] %v493_v0  ;;  %v431_v12 = vadd.f32 %v775_v51, %v239_v3  ;;  %v783_v13 = vunpack.c.l.bf16 %v909_v63  ;;  %v883_v3 = vld [vmem:[%s1478_s0 + $0x78] sm:$0xff]  }
  0x1e   :  { %v494_v11 = vmax.f32 %v430_v2, 0.0  ;;  %v656_v14 = vunpack.c.h.bf16 %v878_v58  ;;  %v241_v16 = vadd.f32 %v976_v7, %v170_v6  ;;  %v172_v18 = vmul.f32 %v655_v9, %v962_v1 }
  0x1f   :  { %v432_v15 = vadd.f32 %v776_v53, %v240_v5  ;;  %v242_v17 = vadd.f32 %v976_v7, %v171_v8  ;;  %v495_v20 = vmax.f32 %v431_v12, 0.0  ;;  %v784_v22 = vunpack.c.h.bf16 %v909_v63 }
  0x20   :  { %558 = vst [vmem:[%s1482_s4 + $0x78] sm:$0xff] %v494_v11  ;;  %v173_v21 = vmul.f32 %v656_v14, %v962_v1  ;;  %v659_v23 = vunpack.c.l.bf16 %v879_v10  ;;  %v433_v25 = vadd.f32 %v779_v61, %v241_v16  ;;  %v243_v27 = vadd.f32 %v976_v7, %v172_v18 }
  0x21   :  { %v496_v24 = vmax.f32 %v432_v15, 0.0  ;;  %v434_v26 = vadd.f32 %v780_v4, %v242_v17  ;;  %559 = vst [vmem:[%s1482_s4 + $0x80] sm:$0xff] %v495_v20  ;;  %v787_v31 = vunpack.c.l.bf16 %v910_v19  ;;  %v660_v32 = vunpack.c.h.bf16 %v879_v10 }
  0x22   :  { %v244_v29 = vadd.f32 %v976_v7, %v173_v21  ;;  %v174_v30 = vmul.f32 %v659_v23, %v962_v1  ;;  %v497_v34 = vmax.f32 %v433_v25, 0.0  ;;  %v435_v36 = vadd.f32 %v783_v13, %v243_v27  ;;  %v914_v13 = vld [vmem:[%s1481_s3 + $0x78] sm:$0xff]   ;;  %v915_v27 = vld [vmem:[%s1481_s3 + $0x80] sm:$0xff]  }
  0x23   :  { %560 = vst [vmem:[%s1482_s4 + $0x88] sm:$0xff] %v496_v24  ;;  %v498_v35 = vmax.f32 %v434_v26, 0.0  ;;  %v788_v37 = vunpack.c.h.bf16 %v910_v19  ;;  %v175_v40 = vmul.f32 %v660_v32, %v962_v1  ;;  %v663_v41 = vunpack.c.l.bf16 %v880_v28 }
  0x24   :  { %v436_v38 = vadd.f32 %v784_v22, %v244_v29  ;;  %v245_v39 = vadd.f32 %v976_v7, %v174_v30  ;;  %561 = vst [vmem:[%s1482_s4 + $0x90] sm:$0xff] %v497_v34  ;;  %v499_v44 = vmax.f32 %v435_v36, 0.0  ;;  %v791_v45 = vunpack.c.l.bf16 %v911_v33  ;;  %v884_v22 = vld [vmem:[%s1478_s0 + $0x80] sm:$0xff]   ;;  %v885_v36 = vld [vmem:[%s1478_s0 + $0x88] sm:$0xff]  }
  0x25   :  { %562 = vst [vmem:[%s1482_s4 + $0x98] sm:$0xff] %v498_v35  ;;  %v664_v46 = vunpack.c.h.bf16 %v880_v28  ;;  %v792_v47 = vunpack.c.h.bf16 %v911_v33  ;;  %v246_v50 = vadd.f32 %v976_v7, %v175_v40  ;;  %v176_v51 = vmul.f32 %v663_v41, %v962_v1 }
  0x26   :  { %v500_v48 = vmax.f32 %v436_v38, 0.0  ;;  %v437_v49 = vadd.f32 %v787_v31, %v245_v39  ;;  %563 = vst [vmem:[%s1482_s4 + $0xa0] sm:$0xff] %v499_v44  ;;  %v667_v54 = vunpack.c.l.bf16 %v881_v42  ;;  %v795_v55 = vunpack.c.l.bf16 %v912_v43 }
  0x27   :  { %v177_v53 = vmul.f32 %v664_v46, %v962_v1  ;;  %v668_v56 = vunpack.c.h.bf16 %v881_v42  ;;  %v438_v59 = vadd.f32 %v788_v37, %v246_v50  ;;  %v247_v60 = vadd.f32 %v976_v7, %v176_v51  ;;  %v916_v37 = vld [vmem:[%s1481_s3 + $0x88] sm:$0xff]   ;;  %v886_v46 = vld [vmem:[%s1478_s0 + $0x90] sm:$0xff]  }
  0x28   :  { %564 = vst [vmem:[%s1482_s4 + $0xa8] sm:$0xff] %v500_v48  ;;  %v501_v58 = vmax.f32 %v437_v49, 0.0  ;;  %v796_v61 = vunpack.c.h.bf16 %v912_v43  ;;  %v178_v63 = vmul.f32 %v667_v54, %v962_v1  ;;  %v671_v2 = vunpack.c.l.bf16 %v882_v52  ;;  %v917_v51 = vld [vmem:[%s1481_s3 + $0x90] sm:$0xff]  }
  0x29   :  { %v248_v62 = vadd.f32 %v976_v7, %v177_v53  ;;  %v179_v0 = vmul.f32 %v668_v56, %v962_v1  ;;  %v502_v4 = vmax.f32 %v438_v59, 0.0  ;;  %v439_v5 = vadd.f32 %v791_v45, %v247_v60  ;;  %v887_v60 = vld [vmem:[%s1478_s0 + $0x98] sm:$0xff]  }
  0x2a   :  { %565 = vst [vmem:[%s1482_s4 + $0xb0] sm:$0xff] %v501_v58  ;;  %v799_v6 = vunpack.c.l.bf16 %v913_v57  ;;  %v672_v8 = vunpack.c.h.bf16 %v882_v52  ;;  %v249_v10 = vadd.f32 %v976_v7, %v178_v63  ;;  %v180_v12 = vmul.f32 %v671_v2, %v962_v1 }
  0x2b   :  { %v440_v9 = vadd.f32 %v792_v47, %v248_v62  ;;  %v250_v11 = vadd.f32 %v976_v7, %v179_v0  ;;  %566 = vst [vmem:[%s1482_s4 + $0xb8] sm:$0xff] %v502_v4  ;;  %v503_v14 = vmax.f32 %v439_v5, 0.0  ;;  %v800_v16 = vunpack.c.h.bf16 %v913_v57 }
  0x2c   :  { %v181_v15 = vmul.f32 %v672_v8, %v962_v1  ;;  %v675_v17 = vunpack.c.l.bf16 %v883_v3  ;;  %v441_v19 = vadd.f32 %v795_v55, %v249_v10  ;;  %v251_v21 = vadd.f32 %v976_v7, %v180_v12 }
  0x2d   :  { %v504_v18 = vmax.f32 %v440_v9, 0.0  ;;  %v442_v20 = vadd.f32 %v796_v61, %v250_v11  ;;  %567 = vst [vmem:[%s1482_s4 + $0xc0] sm:$0xff] %v503_v14  ;;  %v803_v25 = vunpack.c.l.bf16 %v914_v13  ;;  %v676_v26 = vunpack.c.h.bf16 %v883_v3 }
  0x2e   :  { %v252_v23 = vadd.f32 %v976_v7, %v181_v15  ;;  %v182_v24 = vmul.f32 %v675_v17, %v962_v1  ;;  %v505_v28 = vmax.f32 %v441_v19, 0.0  ;;  %v443_v30 = vadd.f32 %v799_v6, %v251_v21  ;;  %v918_v6 = vld [vmem:[%s1481_s3 + $0x98] sm:$0xff]   ;;  %v919_v21 = vld [vmem:[%s1481_s3 + $0xa0] sm:$0xff]  }
  0x2f   :  { %568 = vst [vmem:[%s1482_s4 + $0xc8] sm:$0xff] %v504_v18  ;;  %v506_v29 = vmax.f32 %v442_v20, 0.0  ;;  %v804_v31 = vunpack.c.h.bf16 %v914_v13  ;;  %v183_v34 = vmul.f32 %v676_v26, %v962_v1  ;;  %v679_v35 = vunpack.c.l.bf16 %v884_v22 }
  0x30   :  { %v444_v32 = vadd.f32 %v800_v16, %v252_v23  ;;  %v253_v33 = vadd.f32 %v976_v7, %v182_v24  ;;  %569 = vst [vmem:[%s1482_s4 + $0xd0] sm:$0xff] %v505_v28  ;;  %v507_v38 = vmax.f32 %v443_v30, 0.0  ;;  %v807_v39 = vunpack.c.l.bf16 %v915_v27  ;;  %v888_v16 = vld [vmem:[%s1478_s0 + $0xa0] sm:$0xff]   ;;  %v889_v30 = vld [vmem:[%s1478_s0 + $0xa8] sm:$0xff]  }
  0x31   :  { %570 = vst [vmem:[%s1482_s4 + $0xd8] sm:$0xff] %v506_v29  ;;  %v680_v40 = vunpack.c.h.bf16 %v884_v22  ;;  %v808_v41 = vunpack.c.h.bf16 %v915_v27  ;;  %v254_v44 = vadd.f32 %v976_v7, %v183_v34  ;;  %v184_v45 = vmul.f32 %v679_v35, %v962_v1 }
  0x32   :  { %v508_v42 = vmax.f32 %v444_v32, 0.0  ;;  %v445_v43 = vadd.f32 %v803_v25, %v253_v33  ;;  %571 = vst [vmem:[%s1482_s4 + $0xe0] sm:$0xff] %v507_v38  ;;  %v683_v48 = vunpack.c.l.bf16 %v885_v36  ;;  %v811_v49 = vunpack.c.l.bf16 %v916_v37 }
  0x33   :  { %v185_v47 = vmul.f32 %v680_v40, %v962_v1  ;;  %v684_v50 = vunpack.c.h.bf16 %v885_v36  ;;  %v446_v53 = vadd.f32 %v804_v31, %v254_v44  ;;  %v255_v54 = vadd.f32 %v976_v7, %v184_v45  ;;  %v920_v31 = vld [vmem:[%s1481_s3 + $0xa8] sm:$0xff]   ;;  %v890_v40 = vld [vmem:[%s1478_s0 + $0xb0] sm:$0xff]  }
  0x34   :  { %572 = vst [vmem:[%s1482_s4 + $0xe8] sm:$0xff] %v508_v42  ;;  %v509_v52 = vmax.f32 %v445_v43, 0.0  ;;  %v812_v55 = vunpack.c.h.bf16 %v916_v37  ;;  %v186_v57 = vmul.f32 %v683_v48, %v962_v1  ;;  %v687_v59 = vunpack.c.l.bf16 %v886_v46  ;;  %v921_v45 = vld [vmem:[%s1481_s3 + $0xb0] sm:$0xff]  }
  0x35   :  { %v256_v56 = vadd.f32 %v976_v7, %v185_v47  ;;  %v187_v58 = vmul.f32 %v684_v50, %v962_v1  ;;  %v510_v61 = vmax.f32 %v446_v53, 0.0  ;;  %v447_v62 = vadd.f32 %v807_v39, %v255_v54  ;;  %v891_v54 = vld [vmem:[%s1478_s0 + $0xb8] sm:$0xff]  }
  0x36   :  { %573 = vst [vmem:[%s1482_s4 + $0xf0] sm:$0xff] %v509_v52  ;;  %v815_v63 = vunpack.c.l.bf16 %v917_v51  ;;  %v688_v0 = vunpack.c.h.bf16 %v886_v46  ;;  %v257_v3 = vadd.f32 %v976_v7, %v186_v57  ;;  %v188_v5 = vmul.f32 %v687_v59, %v962_v1 }
  0x37   :  { %v448_v2 = vadd.f32 %v808_v41, %v256_v56  ;;  %v258_v4 = vadd.f32 %v976_v7, %v187_v58  ;;  %574 = vst [vmem:[%s1482_s4 + $0xf8] sm:$0xff] %v510_v61  ;;  %v511_v8 = vmax.f32 %v447_v62, 0.0  ;;  %v816_v10 = vunpack.c.h.bf16 %v917_v51 }
  0x38   :  { %v189_v9 = vmul.f32 %v688_v0, %v962_v1  ;;  %v691_v11 = vunpack.c.l.bf16 %v887_v60  ;;  %v449_v13 = vadd.f32 %v811_v49, %v257_v3  ;;  %v259_v15 = vadd.f32 %v976_v7, %v188_v5 }
  0x39   :  { %v512_v12 = vmax.f32 %v448_v2, 0.0  ;;  %v450_v14 = vadd.f32 %v812_v55, %v258_v4  ;;  %575 = vst [vmem:[%s1482_s4 + $0x100] sm:$0xff] %v511_v8  ;;  %v819_v19 = vunpack.c.l.bf16 %v918_v6  ;;  %v692_v20 = vunpack.c.h.bf16 %v887_v60 }
  0x3a   :  { %v260_v17 = vadd.f32 %v976_v7, %v189_v9  ;;  %v190_v18 = vmul.f32 %v691_v11, %v962_v1  ;;  %v513_v22 = vmax.f32 %v449_v13, 0.0  ;;  %v451_v24 = vadd.f32 %v815_v63, %v259_v15  ;;  %v922_v63 = vld [vmem:[%s1481_s3 + $0xb8] sm:$0xff]   ;;  %v923_v15 = vld [vmem:[%s1481_s3 + $0xc0] sm:$0xff]  }
  0x3b   :  { %576 = vst [vmem:[%s1482_s4 + $0x108] sm:$0xff] %v512_v12  ;;  %v514_v23 = vmax.f32 %v450_v14, 0.0  ;;  %v820_v25 = vunpack.c.h.bf16 %v918_v6  ;;  %v191_v28 = vmul.f32 %v692_v20, %v962_v1  ;;  %v695_v29 = vunpack.c.l.bf16 %v888_v16 }
  0x3c   :  { %v452_v26 = vadd.f32 %v816_v10, %v260_v17  ;;  %v261_v27 = vadd.f32 %v976_v7, %v190_v18  ;;  %577 = vst [vmem:[%s1482_s4 + $0x110] sm:$0xff] %v513_v22  ;;  %v515_v32 = vmax.f32 %v451_v24, 0.0  ;;  %v823_v33 = vunpack.c.l.bf16 %v919_v21  ;;  %v892_v10 = vld [vmem:[%s1478_s0 + $0xc0] sm:$0xff]   ;;  %v893_v24 = vld [vmem:[%s1478_s0 + $0xc8] sm:$0xff]  }
  0x3d   :  { %578 = vst [vmem:[%s1482_s4 + $0x118] sm:$0xff] %v514_v23  ;;  %v696_v34 = vunpack.c.h.bf16 %v888_v16  ;;  %v824_v35 = vunpack.c.h.bf16 %v919_v21  ;;  %v262_v38 = vadd.f32 %v976_v7, %v191_v28  ;;  %v192_v39 = vmul.f32 %v695_v29, %v962_v1 }
  0x3e   :  { %v516_v36 = vmax.f32 %v452_v26, 0.0  ;;  %v453_v37 = vadd.f32 %v819_v19, %v261_v27  ;;  %579 = vst [vmem:[%s1482_s4 + $0x120] sm:$0xff] %v515_v32  ;;  %v699_v42 = vunpack.c.l.bf16 %v889_v30  ;;  %v827_v43 = vunpack.c.l.bf16 %v920_v31 }
  0x3f   :  { %v193_v41 = vmul.f32 %v696_v34, %v962_v1  ;;  %v700_v44 = vunpack.c.h.bf16 %v889_v30  ;;  %v454_v47 = vadd.f32 %v820_v25, %v262_v38  ;;  %v263_v48 = vadd.f32 %v976_v7, %v192_v39  ;;  %v924_v25 = vld [vmem:[%s1481_s3 + $0xc8] sm:$0xff]   ;;  %v894_v34 = vld [vmem:[%s1478_s0 + $0xd0] sm:$0xff]  }
  0x40   :  { %580 = vst [vmem:[%s1482_s4 + $0x128] sm:$0xff] %v516_v36  ;;  %v517_v46 = vmax.f32 %v453_v37, 0.0  ;;  %v828_v49 = vunpack.c.h.bf16 %v920_v31  ;;  %v194_v51 = vmul.f32 %v699_v42, %v962_v1  ;;  %v703_v53 = vunpack.c.l.bf16 %v890_v40  ;;  %v925_v39 = vld [vmem:[%s1481_s3 + $0xd0] sm:$0xff]  }
  0x41   :  { %v264_v50 = vadd.f32 %v976_v7, %v193_v41  ;;  %v195_v52 = vmul.f32 %v700_v44, %v962_v1  ;;  %v518_v55 = vmax.f32 %v454_v47, 0.0  ;;  %v455_v56 = vadd.f32 %v823_v33, %v263_v48  ;;  %v895_v48 = vld [vmem:[%s1478_s0 + $0xd8] sm:$0xff]  }
  0x42   :  { %581 = vst [vmem:[%s1482_s4 + $0x130] sm:$0xff] %v517_v46  ;;  %v831_v57 = vunpack.c.l.bf16 %v921_v45  ;;  %v704_v58 = vunpack.c.h.bf16 %v890_v40  ;;  %v265_v60 = vadd.f32 %v976_v7, %v194_v51  ;;  %v196_v62 = vmul.f32 %v703_v53, %v962_v1 }
  0x43   :  { %v456_v59 = vadd.f32 %v824_v35, %v264_v50  ;;  %v266_v61 = vadd.f32 %v976_v7, %v195_v52  ;;  %582 = vst [vmem:[%s1482_s4 + $0x138] sm:$0xff] %v518_v55  ;;  %v519_v0 = vmax.f32 %v455_v56, 0.0  ;;  %v832_v3 = vunpack.c.h.bf16 %v921_v45 }
  0x44   :  { %v197_v2 = vmul.f32 %v704_v58, %v962_v1  ;;  %v707_v4 = vunpack.c.l.bf16 %v891_v54  ;;  %v457_v6 = vadd.f32 %v827_v43, %v265_v60  ;;  %v267_v9 = vadd.f32 %v976_v7, %v196_v62 }
  0x45   :  { %v520_v5 = vmax.f32 %v456_v59, 0.0  ;;  %v458_v8 = vadd.f32 %v828_v49, %v266_v61  ;;  %583 = vst [vmem:[%s1482_s4 + $0x140] sm:$0xff] %v519_v0  ;;  %v835_v13 = vunpack.c.l.bf16 %v922_v63  ;;  %v708_v14 = vunpack.c.h.bf16 %v891_v54 }
  0x46   :  { %v268_v11 = vadd.f32 %v976_v7, %v197_v2  ;;  %v198_v12 = vmul.f32 %v707_v4, %v962_v1  ;;  %v521_v16 = vmax.f32 %v457_v6, 0.0  ;;  %v459_v18 = vadd.f32 %v831_v57, %v267_v9  ;;  %v926_v57 = vld [vmem:[%s1481_s3 + $0xd8] sm:$0xff]   ;;  %v927_v9 = vld [vmem:[%s1481_s3 + $0xe0] sm:$0xff]  }
  0x47   :  { %584 = vst [vmem:[%s1482_s4 + $0x148] sm:$0xff] %v520_v5  ;;  %v522_v17 = vmax.f32 %v458_v8, 0.0  ;;  %v836_v19 = vunpack.c.h.bf16 %v922_v63  ;;  %v199_v22 = vmul.f32 %v708_v14, %v962_v1  ;;  %v711_v23 = vunpack.c.l.bf16 %v892_v10 }
  0x48   :  { %v460_v20 = vadd.f32 %v832_v3, %v268_v11  ;;  %v269_v21 = vadd.f32 %v976_v7, %v198_v12  ;;  %585 = vst [vmem:[%s1482_s4 + $0x150] sm:$0xff] %v521_v16  ;;  %v523_v26 = vmax.f32 %v459_v18, 0.0  ;;  %v839_v27 = vunpack.c.l.bf16 %v923_v15  ;;  %v896_v3 = vld [vmem:[%s1478_s0 + $0xe0] sm:$0xff]   ;;  %v897_v18 = vld [vmem:[%s1478_s0 + $0xe8] sm:$0xff]  }
  0x49   :  { %586 = vst [vmem:[%s1482_s4 + $0x158] sm:$0xff] %v522_v17  ;;  %v712_v28 = vunpack.c.h.bf16 %v892_v10  ;;  %v840_v29 = vunpack.c.h.bf16 %v923_v15  ;;  %v270_v32 = vadd.f32 %v976_v7, %v199_v22  ;;  %v200_v33 = vmul.f32 %v711_v23, %v962_v1 }
  0x4a   :  { %v524_v30 = vmax.f32 %v460_v20, 0.0  ;;  %v461_v31 = vadd.f32 %v835_v13, %v269_v21  ;;  %587 = vst [vmem:[%s1482_s4 + $0x160] sm:$0xff] %v523_v26  ;;  %v715_v36 = vunpack.c.l.bf16 %v893_v24  ;;  %v843_v37 = vunpack.c.l.bf16 %v924_v25 }
  0x4b   :  { %v201_v35 = vmul.f32 %v712_v28, %v962_v1  ;;  %v716_v38 = vunpack.c.h.bf16 %v893_v24  ;;  %v462_v41 = vadd.f32 %v836_v19, %v270_v32  ;;  %v271_v42 = vadd.f32 %v976_v7, %v200_v33  ;;  %v928_v19 = vld [vmem:[%s1481_s3 + $0xe8] sm:$0xff]   ;;  %v898_v28 = vld [vmem:[%s1478_s0 + $0xf0] sm:$0xff]  }
  0x4c   :  { %588 = vst [vmem:[%s1482_s4 + $0x168] sm:$0xff] %v524_v30  ;;  %v525_v40 = vmax.f32 %v461_v31, 0.0  ;;  %v844_v43 = vunpack.c.h.bf16 %v924_v25  ;;  %v202_v45 = vmul.f32 %v715_v36, %v962_v1  ;;  %v719_v47 = vunpack.c.l.bf16 %v894_v34  ;;  %v929_v33 = vld [vmem:[%s1481_s3 + $0xf0] sm:$0xff]  }
  0x4d   :  { %v272_v44 = vadd.f32 %v976_v7, %v201_v35  ;;  %v203_v46 = vmul.f32 %v716_v38, %v962_v1  ;;  %v526_v49 = vmax.f32 %v462_v41, 0.0  ;;  %v463_v50 = vadd.f32 %v839_v27, %v271_v42  ;;  %v899_v42 = vld [vmem:[%s1478_s0 + $0xf8] sm:$0xff]  }
  0x4e   :  { %589 = vst [vmem:[%s1482_s4 + $0x170] sm:$0xff] %v525_v40  ;;  %v847_v51 = vunpack.c.l.bf16 %v925_v39  ;;  %v720_v52 = vunpack.c.h.bf16 %v894_v34  ;;  %v273_v54 = vadd.f32 %v976_v7, %v202_v45  ;;  %v204_v56 = vmul.f32 %v719_v47, %v962_v1 }
  0x4f   :  { %v464_v53 = vadd.f32 %v840_v29, %v272_v44  ;;  %v274_v55 = vadd.f32 %v976_v7, %v203_v46  ;;  %590 = vst [vmem:[%s1482_s4 + $0x178] sm:$0xff] %v526_v49  ;;  %v527_v58 = vmax.f32 %v463_v50, 0.0  ;;  %v848_v60 = vunpack.c.h.bf16 %v925_v39 }
  0x50   :  { %v205_v59 = vmul.f32 %v720_v52, %v962_v1  ;;  %v723_v61 = vunpack.c.l.bf16 %v895_v48  ;;  %v465_v63 = vadd.f32 %v843_v37, %v273_v54  ;;  %v275_v2 = vadd.f32 %v976_v7, %v204_v56 }
  0x51   :  { %v528_v62 = vmax.f32 %v464_v53, 0.0  ;;  %v466_v0 = vadd.f32 %v844_v43, %v274_v55  ;;  %591 = vst [vmem:[%s1482_s4 + $0x180] sm:$0xff] %v527_v58  ;;  %v851_v6 = vunpack.c.l.bf16 %v926_v57  ;;  %v724_v8 = vunpack.c.h.bf16 %v895_v48 }
  0x52   :  { %v276_v4 = vadd.f32 %v976_v7, %v205_v59  ;;  %v206_v5 = vmul.f32 %v723_v61, %v962_v1  ;;  %v529_v10 = vmax.f32 %v465_v63, 0.0  ;;  %v467_v12 = vadd.f32 %v847_v51, %v275_v2  ;;  %v930_v51 = vld [vmem:[%s1481_s3 + $0xf8] sm:$0xff]  }
  0x53   :  { %592 = vst [vmem:[%s1482_s4 + $0x188] sm:$0xff] %v528_v62  ;;  %v530_v11 = vmax.f32 %v466_v0, 0.0  ;;  %v852_v13 = vunpack.c.h.bf16 %v926_v57  ;;  %v207_v16 = vmul.f32 %v724_v8, %v962_v1  ;;  %v727_v17 = vunpack.c.l.bf16 %v896_v3 }
  0x54   :  { %v468_v14 = vadd.f32 %v848_v60, %v276_v4  ;;  %v277_v15 = vadd.f32 %v976_v7, %v206_v5  ;;  %593 = vst [vmem:[%s1482_s4 + $0x190] sm:$0xff] %v529_v10  ;;  %v531_v20 = vmax.f32 %v467_v12, 0.0  ;;  %v855_v21 = vunpack.c.l.bf16 %v927_v9 }
  0x55   :  { %594 = vst [vmem:[%s1482_s4 + $0x198] sm:$0xff] %v530_v11  ;;  %v728_v22 = vunpack.c.h.bf16 %v896_v3  ;;  %v856_v23 = vunpack.c.h.bf16 %v927_v9  ;;  %v278_v26 = vadd.f32 %v976_v7, %v207_v16  ;;  %v208_v27 = vmul.f32 %v727_v17, %v962_v1 }
  0x56   :  { %v532_v24 = vmax.f32 %v468_v14, 0.0  ;;  %v469_v25 = vadd.f32 %v851_v6, %v277_v15  ;;  %595 = vst [vmem:[%s1482_s4 + $0x1a0] sm:$0xff] %v531_v20  ;;  %v731_v30 = vunpack.c.l.bf16 %v897_v18  ;;  %v859_v31 = vunpack.c.l.bf16 %v928_v19 }
  0x57   :  { %v209_v29 = vmul.f32 %v728_v22, %v962_v1  ;;  %v732_v32 = vunpack.c.h.bf16 %v897_v18  ;;  %v470_v35 = vadd.f32 %v852_v13, %v278_v26  ;;  %v279_v36 = vadd.f32 %v976_v7, %v208_v27 }
  0x58   :  { %596 = vst [vmem:[%s1482_s4 + $0x1a8] sm:$0xff] %v532_v24  ;;  %v533_v34 = vmax.f32 %v469_v25, 0.0  ;;  %v860_v37 = vunpack.c.h.bf16 %v928_v19  ;;  %v210_v39 = vmul.f32 %v731_v30, %v962_v1  ;;  %v735_v41 = vunpack.c.l.bf16 %v898_v28 }
  0x59   :  { %v280_v38 = vadd.f32 %v976_v7, %v209_v29  ;;  %v211_v40 = vmul.f32 %v732_v32, %v962_v1  ;;  %v534_v43 = vmax.f32 %v470_v35, 0.0  ;;  %v471_v44 = vadd.f32 %v855_v21, %v279_v36 }
  0x5a   :  { %597 = vst [vmem:[%s1482_s4 + $0x1b0] sm:$0xff] %v533_v34  ;;  %v863_v45 = vunpack.c.l.bf16 %v929_v33  ;;  %v736_v46 = vunpack.c.h.bf16 %v898_v28  ;;  %v281_v48 = vadd.f32 %v976_v7, %v210_v39  ;;  %v212_v50 = vmul.f32 %v735_v41, %v962_v1 }
  0x5b   :  { %v472_v47 = vadd.f32 %v856_v23, %v280_v38  ;;  %v282_v49 = vadd.f32 %v976_v7, %v211_v40  ;;  %598 = vst [vmem:[%s1482_s4 + $0x1b8] sm:$0xff] %v534_v43  ;;  %v535_v52 = vmax.f32 %v471_v44, 0.0  ;;  %v864_v54 = vunpack.c.h.bf16 %v929_v33 }
  0x5c   :  { %v213_v53 = vmul.f32 %v736_v46, %v962_v1  ;;  %v739_v55 = vunpack.c.l.bf16 %v899_v42  ;;  %v473_v57 = vadd.f32 %v859_v31, %v281_v48  ;;  %v283_v59 = vadd.f32 %v976_v7, %v212_v50 }
  0x5d   :  { %v536_v56 = vmax.f32 %v472_v47, 0.0  ;;  %v474_v58 = vadd.f32 %v860_v37, %v282_v49  ;;  %599 = vst [vmem:[%s1482_s4 + $0x1c0] sm:$0xff] %v535_v52  ;;  %v867_v62 = vunpack.c.l.bf16 %v930_v51  ;;  %v740_v63 = vunpack.c.h.bf16 %v899_v42 }
  0x5e   :  { %v284_v60 = vadd.f32 %v976_v7, %v213_v53  ;;  %v214_v61 = vmul.f32 %v739_v55, %v962_v1  ;;  %v537_v0 = vmax.f32 %v473_v57, 0.0  ;;  %v475_v3 = vadd.f32 %v863_v45, %v283_v59 }
  0x5f   :  { %600 = vst [vmem:[%s1482_s4 + $0x1c8] sm:$0xff] %v536_v56  ;;  %v538_v2 = vmax.f32 %v474_v58, 0.0  ;;  %v215_v6 = vmul.f32 %v740_v63, %v962_v1  ;;  %v868_v8 = vunpack.c.h.bf16 %v930_v51 }
  0x60   :  { %v476_v4 = vadd.f32 %v864_v54, %v284_v60  ;;  %v285_v5 = vadd.f32 %v976_v7, %v214_v61  ;;  %601 = vst [vmem:[%s1482_s4 + $0x1d0] sm:$0xff] %v537_v0  ;;  %v539_v9 = vmax.f32 %v475_v3, 0.0 }
  0x61   :  { %602 = vst [vmem:[%s1482_s4 + $0x1d8] sm:$0xff] %v538_v2  ;;  %v286_v12 = vadd.f32 %v976_v7, %v215_v6 }
  0x62   :  { %v540_v10 = vmax.f32 %v476_v4, 0.0  ;;  %v477_v11 = vadd.f32 %v867_v62, %v285_v5  ;;  %603 = vst [vmem:[%s1482_s4 + $0x1e0] sm:$0xff] %v539_v9 }
  0x63   :  { %v478_v13 = vadd.f32 %v868_v8, %v286_v12 }
  0x64   :  { %604 = vst [vmem:[%s1482_s4 + $0x1e8] sm:$0xff] %v540_v10  ;;  %v541_v1 = vmax.f32 %v477_v11, 0.0 }
  0x65   :  { %v542_v14 = vmax.f32 %v478_v13, 0.0 }
  0x66   :  { %605 = vst [vmem:[%s1482_s4 + $0x1f0] sm:$0xff] %v541_v1 }
  0x67   :  { %606 = vst [vmem:[%s1482_s4 + $0x1f8] sm:$0xff] %v542_v14 }

</bundles_post_ra>
